<compile_context>
chip_gen: v6e
topology: v6e:2x2x1
jax: 0.10.0
libtpu: 0.0.40
codegen_flags: <defaults>
</compile_context>

<pallas_src>
import math

import jax
import jax.numpy as jnp
from jax.experimental import pallas as pl
from jax.experimental.pallas import tpu as pltpu

LOG2 = math.log(2.0)
_LANE = 128
_SUBLANE = 8


def _shifted_softplus(v):
    # numerically-stable softplus(v) - log(2)
    return jnp.maximum(v, 0.0) + jnp.log(1.0 + jnp.exp(-jnp.abs(v))) - LOG2


def _interaction_kernel(
    x_ref,       # (A, B)  f32  resident
    fij_ref,     # (T, R)  f32  per pair-tile
    rcut_ref,    # (1, T)  f32  per pair-tile (lane-dense)
    idxi_ref,    # (1, T)  i32  per pair-tile
    idxj_ref,    # (1, T)  i32  per pair-tile
    w_in2f_ref,  # (B, F)
    w_f1_ref, b_f1_ref,   # (R, F), (1, F)
    w_f2_ref, b_f2_ref,   # (F, F), (1, F)
    w_o1_ref, b_o1_ref,   # (F, B), (1, B)
    w_o2_ref, b_o2_ref,   # (B, B), (1, B)
    out_ref,     # (A, B)
    xf_ref,      # scratch (A, F) f32 : in2f(x), computed once at t == 0
    xs_ref,      # scratch (A, F) f32 : scatter-add accumulator across pair tiles
):
    t = pl.program_id(0)
    n_tiles = pl.num_programs(0)
    A = xf_ref.shape[0]
    T = fij_ref.shape[0]

    @pl.when(t == 0)
    def _init():
        xf_ref[...] = jnp.dot(x_ref[...], w_in2f_ref[...],
                              preferred_element_type=jnp.float32)
        xs_ref[...] = jnp.zeros_like(xs_ref)

    # ---- filter network on this pair tile (rcut is applied via scatter weights)
    h = jnp.dot(fij_ref[...], w_f1_ref[...], preferred_element_type=jnp.float32)
    h = _shifted_softplus(h + b_f1_ref[...])
    wij = jnp.dot(h, w_f2_ref[...], preferred_element_type=jnp.float32) + b_f2_ref[...]

    # ---- tile-local one-hots, built transposed as (atoms, pairs): the (1, T)
    # lane-aligned index rows broadcast along sublanes with no relayout.
    atom_iota = jax.lax.broadcasted_iota(jnp.int32, (A, T), 0)
    oh_jT = (idxj_ref[...] == atom_iota).astype(jnp.float32)            # (A, T)

    # gather: x_j[p, :] = xf[idx_j[p], :]  ==  oh_jT^T @ xf  (contract over atoms)
    x_j = jax.lax.dot_general(
        oh_jT, xf_ref[...],
        dimension_numbers=(((0,), (0,)), ((), ())),
        preferred_element_type=jnp.float32,
    )                                                                   # (T, F)
    x_ij = x_j * wij

    # scatter-add with rcut folded into the one-hot weights (exactly equivalent
    # to x_ij * rcut[:, None]); padded pairs carry rcut == 0 -> no contribution.
    oh_iT = jnp.where(idxi_ref[...] == atom_iota, rcut_ref[...], 0.0)   # (A, T)
    xs_ref[...] += jnp.dot(oh_iT, x_ij, preferred_element_type=jnp.float32)

    @pl.when(t == n_tiles - 1)
    def _finalize():
        h2 = jnp.dot(xs_ref[...], w_o1_ref[...], preferred_element_type=jnp.float32)
        h2 = _shifted_softplus(h2 + b_o1_ref[...])
        out = jnp.dot(h2, w_o2_ref[...], preferred_element_type=jnp.float32) + b_o2_ref[...]
        out_ref[...] = out.astype(out_ref.dtype)


def _round_up(n, m):
    return ((n + m - 1) // m) * m


def interaction_block(x, f_ij, idx_i, idx_j, rcut_ij, params, *, tile_pairs=512):
    """Pair-tiled Pallas implementation of the SchNet InteractionBlock forward."""
    n_atoms, n_atom_basis = x.shape
    n_pairs, n_rbf = f_ij.shape
    n_filters = params["w_in2f"].shape[1]

    # lane/sublane-aligned padded sizes (zero padding is exact, see header)
    A = _round_up(n_atoms, _SUBLANE)
    B = _round_up(n_atom_basis, _LANE)
    R = _round_up(n_rbf, _LANE)
    F = _round_up(n_filters, _LANE)
    T = min(_round_up(tile_pairs, _LANE), _round_up(n_pairs, _LANE))
    P = _round_up(n_pairs, T)
    n_tiles = P // T

    def pad2(a, rows, cols, dtype=jnp.float32):
        a = jnp.asarray(a, dtype)
        return jnp.pad(a, ((0, rows - a.shape[0]), (0, cols - a.shape[1])))

    def pad_row(a, cols, dtype):
        a = jnp.asarray(a, dtype)
        return jnp.pad(a, (0, cols - a.shape[0])).reshape(1, cols)

    args = (
        pad2(x, A, B),
        pad2(f_ij, P, R),
        pad_row(rcut_ij, P, jnp.float32),     # padded pairs -> rcut == 0
        pad_row(idx_i, P, jnp.int32),
        pad_row(idx_j, P, jnp.int32),
        pad2(params["w_in2f"], B, F),
        pad2(params["w_f1"], R, F), pad2(params["b_f1"], 1, F),
        pad2(params["w_f2"], F, F), pad2(params["b_f2"], 1, F),
        pad2(params["w_o1"], F, B), pad2(params["b_o1"], 1, B),
        pad2(params["w_o2"], B, B), pad2(params["b_o2"], 1, B),
    )

    def resident(shape):
        return pl.BlockSpec(shape, lambda t: (0,) * len(shape))

    in_specs = [
        resident((A, B)),                              # x     (used only at t == 0)
        pl.BlockSpec((T, R), lambda t: (t, 0)),        # f_ij  pair tile (pipelined)
        pl.BlockSpec((1, T), lambda t: (0, t)),        # rcut  lane-dense pair tile
        pl.BlockSpec((1, T), lambda t: (0, t)),        # idx_i
        pl.BlockSpec((1, T), lambda t: (0, t)),        # idx_j
        resident((B, F)),                              # w_in2f
        resident((R, F)), resident((1, F)),            # filter net layer 1
        resident((F, F)), resident((1, F)),            # filter net layer 2
        resident((F, B)), resident((1, B)),            # f2out layer 1
        resident((B, B)), resident((1, B)),            # f2out layer 2
    ]

    out_padded = pl.pallas_call(
        _interaction_kernel,
        out_shape=jax.ShapeDtypeStruct((A, B), jnp.float32),
        grid_spec=pltpu.PrefetchScalarGridSpec(
            num_scalar_prefetch=0,
            grid=(n_tiles,),
            in_specs=in_specs,
            out_specs=pl.BlockSpec((A, B), lambda t: (0, 0)),
            scratch_shapes=[pltpu.VMEM((A, F), jnp.float32),   # xf (in2f result)
                            pltpu.VMEM((A, F), jnp.float32)],  # xs accumulator
        ),
        compiler_params=pltpu.CompilerParams(
            # single grid axis is a reduction into the xs accumulator
            dimension_semantics=("arbitrary",),
            # sized to stay inside default scoped VMEM on every generation
            # (incl. v7x's 64 MiB physical); re-derive tile_pairs if A/F grow.
            vmem_limit_bytes=32 * 1024 * 1024,
        ),
    )(*args)

    return out_padded[:n_atoms, :n_atom_basis]


def reference(x, f_ij, idx_i, idx_j, rcut_ij, params):
    """Plain-JAX reference reproducing the PyTorch forward exactly."""
    xf = x @ params["w_in2f"]
    h = _shifted_softplus(f_ij @ params["w_f1"] + params["b_f1"])
    wij = h @ params["w_f2"] + params["b_f2"]
    wij = wij * rcut_ij[:, None]
    x_j = xf[idx_j]
    x_ij = x_j * wij
    xs = jax.ops.segment_sum(x_ij, idx_i, num_segments=x.shape[0])
    h2 = _shifted_softplus(xs @ params["w_o1"] + params["b_o1"])
    return h2 @ params["w_o2"] + params["b_o2"]


def make_params(key, n_atom_basis, n_rbf, n_filters):
    ks = jax.random.split(key, 9)

    def xavier(k, fan_in, fan_out):
        lim = math.sqrt(6.0 / (fan_in + fan_out))
        return jax.random.uniform(k, (fan_in, fan_out), jnp.float32, -lim, lim)

    return {
        "w_in2f": xavier(ks[0], n_atom_basis, n_filters),
        "w_f1": xavier(ks[1], n_rbf, n_filters),
        "b_f1": jax.random.normal(ks[2], (1, n_filters), jnp.float32) * 0.1,
        "w_f2": xavier(ks[3], n_filters, n_filters),
        "b_f2": jax.random.normal(ks[4], (1, n_filters), jnp.float32) * 0.1,
        "w_o1": xavier(ks[5], n_filters, n_atom_basis),
        "b_o1": jax.random.normal(ks[6], (1, n_atom_basis), jnp.float32) * 0.1,
        "w_o2": xavier(ks[7], n_atom_basis, n_atom_basis),
        "b_o2": jax.random.normal(ks[8], (1, n_atom_basis), jnp.float32) * 0.1,
    }


if __name__ == "__main__":
    n_atoms, n_pairs = 8, 16
    n_atom_basis, n_rbf, n_filters = 32, 16, 32

    key = jax.random.PRNGKey(0)
    k_x, k_f, k_i, k_j, k_r, k_p = jax.random.split(key, 6)

    x = jax.random.normal(k_x, (n_atoms, n_atom_basis), jnp.float32)
    f_ij = jax.random.normal(k_f, (n_pairs, n_rbf), jnp.float32)
    idx_i = jax.random.randint(k_i, (n_pairs,), 0, n_atoms, jnp.int32)
    idx_j = jax.random.randint(k_j, (n_pairs,), 0, n_atoms, jnp.int32)
    rcut_ij = jax.random.uniform(k_r, (n_pairs,), jnp.float32)

    params = make_params(k_p, n_atom_basis, n_rbf, n_filters)

    out = interaction_block(x, f_ij, idx_i, idx_j, rcut_ij, params)
    out = jax.block_until_ready(out)

    ref = reference(x, f_ij, idx_i, idx_j, rcut_ij, params)
    assert out.shape == (n_atoms, n_atom_basis)
    assert jnp.allclose(out, ref, atol=5e-4, rtol=5e-4), (
        f"max abs err = {jnp.max(jnp.abs(out - ref))}")

    print("KERNEL_OK")
</pallas_src>

<mosaic_0001>
module attributes {stable_mosaic.version = 11 : i64} {
  func.func @_interaction_kernel(%arg0: i32, %arg1: memref<8x128xf32, #tpu.memory_space<vmem>>, %arg2: memref<128x128xf32, #tpu.memory_space<vmem>>, %arg3: memref<1x128xf32, #tpu.memory_space<vmem>>, %arg4: memref<1x128xi32, #tpu.memory_space<vmem>>, %arg5: memref<1x128xi32, #tpu.memory_space<vmem>>, %arg6: memref<128x128xf32, #tpu.memory_space<vmem>>, %arg7: memref<128x128xf32, #tpu.memory_space<vmem>>, %arg8: memref<1x128xf32, #tpu.memory_space<vmem>>, %arg9: memref<128x128xf32, #tpu.memory_space<vmem>>, %arg10: memref<1x128xf32, #tpu.memory_space<vmem>>, %arg11: memref<128x128xf32, #tpu.memory_space<vmem>>, %arg12: memref<1x128xf32, #tpu.memory_space<vmem>>, %arg13: memref<128x128xf32, #tpu.memory_space<vmem>>, %arg14: memref<1x128xf32, #tpu.memory_space<vmem>>, %arg15: memref<8x128xf32, #tpu.memory_space<vmem>>, %arg16: memref<8x128xf32, #tpu.memory_space<vmem>>, %arg17: memref<8x128xf32, #tpu.memory_space<vmem>>) attributes {dimension_semantics = [#tpu.dimension_semantics<arbitrary>], iteration_bounds = array<i64: 1>, scalar_prefetch = 0 : i64, scratch_operands = 2 : i64, tpu.core_type = #tpu.core_type<tc>, window_params = [{pipeline_mode = #tpu.pipeline_mode<synchronous>, transform_indices = @transform_0, window_bounds = array<i64: 8, 128>}, {transform_indices = @transform_1, window_bounds = array<i64: 128, 128>}, {transform_indices = @transform_2, window_bounds = array<i64: 1, 128>}, {transform_indices = @transform_3, window_bounds = array<i64: 1, 128>}, {transform_indices = @transform_4, window_bounds = array<i64: 1, 128>}, {pipeline_mode = #tpu.pipeline_mode<synchronous>, transform_indices = @transform_5, window_bounds = array<i64: 128, 128>}, {pipeline_mode = #tpu.pipeline_mode<synchronous>, transform_indices = @transform_6, window_bounds = array<i64: 128, 128>}, {pipeline_mode = #tpu.pipeline_mode<synchronous>, transform_indices = @transform_7, window_bounds = array<i64: 1, 128>}, {pipeline_mode = #tpu.pipeline_mode<synchronous>, transform_indices = @transform_8, window_bounds = array<i64: 128, 128>}, {pipeline_mode = #tpu.pipeline_mode<synchronous>, transform_indices = @transform_9, window_bounds = array<i64: 1, 128>}, {pipeline_mode = #tpu.pipeline_mode<synchronous>, transform_indices = @transform_10, window_bounds = array<i64: 128, 128>}, {pipeline_mode = #tpu.pipeline_mode<synchronous>, transform_indices = @transform_11, window_bounds = array<i64: 1, 128>}, {pipeline_mode = #tpu.pipeline_mode<synchronous>, transform_indices = @transform_12, window_bounds = array<i64: 128, 128>}, {pipeline_mode = #tpu.pipeline_mode<synchronous>, transform_indices = @transform_13, window_bounds = array<i64: 1, 128>}, {pipeline_mode = #tpu.pipeline_mode<synchronous>, transform_indices = @transform_14, window_bounds = array<i64: 8, 128>}]} {
    %c0_i32 = arith.constant 0 : i32
    %0 = arith.cmpi eq, %arg0, %c0_i32 : i32
    %1 = arith.extui %0 : i1 to i32
    %c0_i32_0 = arith.constant 0 : i32
    %2 = arith.cmpi ne, %1, %c0_i32_0 : i32
    scf.if %2 {
      %c0_32 = arith.constant 0 : index
      %c0_33 = arith.constant 0 : index
      %50 = vector.load %arg1[%c0_32, %c0_33] : memref<8x128xf32, #tpu.memory_space<vmem>>, vector<8x128xf32>
      %c0_34 = arith.constant 0 : index
      %c0_35 = arith.constant 0 : index
      %51 = vector.load %arg6[%c0_34, %c0_35] : memref<128x128xf32, #tpu.memory_space<vmem>>, vector<128x128xf32>
      %cst_36 = arith.constant dense<0.000000e+00> : vector<8x128xf32>
      %52 = tpu.matmul %50, %51, %cst_36 {dimension_numbers = #tpu.dot_dimension_numbers<[1], [0], [0], [1], [0, 0, 1, 1], [], []>} : vector<8x128xf32>, vector<128x128xf32>, vector<8x128xf32> -> vector<8x128xf32>
      %c0_37 = arith.constant 0 : index
      %c0_38 = arith.constant 0 : index
      %53 = vector.load %arg16[%c0_37, %c0_38] : memref<8x128xf32, #tpu.memory_space<vmem>>, vector<8x128xf32>
      tpu.vector_store %arg16[%c0_37, %c0_38], %52 {strides = array<i32>} : memref<8x128xf32, #tpu.memory_space<vmem>>, vector<8x128xf32>,
      %cst_39 = arith.constant 0.000000e+00 : f32
      %54 = vector.broadcast %cst_39 : f32 to vector<8x128xf32>
      %c0_40 = arith.constant 0 : index
      %c0_41 = arith.constant 0 : index
      %55 = vector.load %arg17[%c0_40, %c0_41] : memref<8x128xf32, #tpu.memory_space<vmem>>, vector<8x128xf32>
      tpu.vector_store %arg17[%c0_40, %c0_41], %54 {strides = array<i32>} : memref<8x128xf32, #tpu.memory_space<vmem>>, vector<8x128xf32>,
    } else {
    }
    %c0 = arith.constant 0 : index
    %c0_1 = arith.constant 0 : index
    %3 = vector.load %arg2[%c0, %c0_1] : memref<128x128xf32, #tpu.memory_space<vmem>>, vector<128x128xf32>
    %c0_2 = arith.constant 0 : index
    %c0_3 = arith.constant 0 : index
    %4 = vector.load %arg7[%c0_2, %c0_3] : memref<128x128xf32, #tpu.memory_space<vmem>>, vector<128x128xf32>
    %cst = arith.constant dense<0.000000e+00> : vector<128x128xf32>
    %5 = tpu.matmul %3, %4, %cst {dimension_numbers = #tpu.dot_dimension_numbers<[1], [0], [0], [1], [0, 0, 1, 1], [], []>} : vector<128x128xf32>, vector<128x128xf32>, vector<128x128xf32> -> vector<128x128xf32>
    %c0_4 = arith.constant 0 : index
    %c0_5 = arith.constant 0 : index
    %6 = vector.load %arg8[%c0_4, %c0_5] : memref<1x128xf32, #tpu.memory_space<vmem>>, vector<1x128xf32>
    %7 = vector.broadcast %6 : vector<1x128xf32> to vector<128x128xf32>
    %8 = arith.addf %5, %7 : vector<128x128xf32>
    %cst_6 = arith.constant 0.000000e+00 : f32
    %9 = vector.broadcast %cst_6 : f32 to vector<128x128xf32>
    %10 = arith.maximumf %8, %9 : vector<128x128xf32>
    %11 = math.absf %8 : vector<128x128xf32>
    %cst_7 = arith.constant 0.000000e+00 : f32
    %12 = vector.broadcast %cst_7 : f32 to vector<128x128xf32>
    %13 = arith.subf %12, %11 : vector<128x128xf32>
    %14 = math.exp %13 : vector<128x128xf32>
    %cst_8 = arith.constant 1.000000e+00 : f32
    %15 = vector.broadcast %cst_8 : f32 to vector<128x128xf32>
    %16 = arith.addf %15, %14 : vector<128x128xf32>
    %17 = math.log %16 : vector<128x128xf32>
    %18 = arith.addf %10, %17 : vector<128x128xf32>
    %cst_9 = arith.constant 0.693147182 : f32
    %19 = vector.broadcast %cst_9 : f32 to vector<128x128xf32>
    %20 = arith.subf %18, %19 : vector<128x128xf32>
    %c0_10 = arith.constant 0 : index
    %c0_11 = arith.constant 0 : index
    %21 = vector.load %arg9[%c0_10, %c0_11] : memref<128x128xf32, #tpu.memory_space<vmem>>, vector<128x128xf32>
    %cst_12 = arith.constant dense<0.000000e+00> : vector<128x128xf32>
    %22 = tpu.matmul %20, %21, %cst_12 {dimension_numbers = #tpu.dot_dimension_numbers<[1], [0], [0], [1], [0, 0, 1, 1], [], []>} : vector<128x128xf32>, vector<128x128xf32>, vector<128x128xf32> -> vector<128x128xf32>
    %c0_13 = arith.constant 0 : index
    %c0_14 = arith.constant 0 : index
    %23 = vector.load %arg10[%c0_13, %c0_14] : memref<1x128xf32, #tpu.memory_space<vmem>>, vector<1x128xf32>
    %24 = vector.broadcast %23 : vector<1x128xf32> to vector<128x128xf32>
    %25 = arith.addf %22, %24 : vector<128x128xf32>
    %26 = tpu.iota {dimensions = array<i32: 0>} : vector<8x128xi32>
    %c0_15 = arith.constant 0 : index
    %c0_16 = arith.constant 0 : index
    %27 = vector.load %arg5[%c0_15, %c0_16] : memref<1x128xi32, #tpu.memory_space<vmem>>, vector<1x128xi32>
    %28 = vector.broadcast %27 : vector<1x128xi32> to vector<8x128xi32>
    %29 = arith.cmpi eq, %28, %26 : vector<8x128xi32>
    %30 = arith.extui %29 : vector<8x128xi1> to vector<8x128xi32>
    %31 = arith.sitofp %30 : vector<8x128xi32> to vector<8x128xf32>
    %c0_17 = arith.constant 0 : index
    %c0_18 = arith.constant 0 : index
    %32 = vector.load %arg16[%c0_17, %c0_18] : memref<8x128xf32, #tpu.memory_space<vmem>>, vector<8x128xf32>
    %cst_19 = arith.constant dense<0.000000e+00> : vector<128x128xf32>
    %33 = tpu.matmul %31, %32, %cst_19 {dimension_numbers = #tpu.dot_dimension_numbers<[0], [0], [1], [1], [0, 1, 1, 1], [], []>} : vector<8x128xf32>, vector<8x128xf32>, vector<128x128xf32> -> vector<128x128xf32>
    %34 = arith.mulf %33, %25 : vector<128x128xf32>
    %c0_20 = arith.constant 0 : index
    %c0_21 = arith.constant 0 : index
    %35 = vector.load %arg4[%c0_20, %c0_21] : memref<1x128xi32, #tpu.memory_space<vmem>>, vector<1x128xi32>
    %36 = vector.broadcast %35 : vector<1x128xi32> to vector<8x128xi32>
    %37 = arith.cmpi eq, %36, %26 : vector<8x128xi32>
    %c0_22 = arith.constant 0 : index
    %c0_23 = arith.constant 0 : index
    %38 = vector.load %arg3[%c0_22, %c0_23] : memref<1x128xf32, #tpu.memory_space<vmem>>, vector<1x128xf32>
    %cst_24 = arith.constant 0.000000e+00 : f32
    %39 = vector.shape_cast %38 : vector<1x128xf32> to vector<1x128xf32>
    %40 = vector.broadcast %39 : vector<1x128xf32> to vector<8x128xf32>
    %41 = vector.broadcast %cst_24 : f32 to vector<8x128xf32>
    %42 = arith.select %37, %40, %41 : vector<8x128xi1>, vector<8x128xf32>
    %c0_25 = arith.constant 0 : index
    %c0_26 = arith.constant 0 : index
    %43 = vector.load %arg17[%c0_25, %c0_26] : memref<8x128xf32, #tpu.memory_space<vmem>>, vector<8x128xf32>
    %cst_27 = arith.constant dense<0.000000e+00> : vector<8x128xf32>
    %44 = tpu.matmul %42, %34, %cst_27 {dimension_numbers = #tpu.dot_dimension_numbers<[1], [0], [0], [1], [0, 0, 1, 1], [], []>} : vector<8x128xf32>, vector<128x128xf32>, vector<8x128xf32> -> vector<8x128xf32>
    %45 = arith.addf %43, %44 : vector<8x128xf32>
    %c0_28 = arith.constant 0 : index
    %c0_29 = arith.constant 0 : index
    %46 = vector.load %arg17[%c0_28, %c0_29] : memref<8x128xf32, #tpu.memory_space<vmem>>, vector<8x128xf32>
    tpu.vector_store %arg17[%c0_28, %c0_29], %45 {strides = array<i32>} : memref<8x128xf32, #tpu.memory_space<vmem>>, vector<8x128xf32>,
    %c0_i32_30 = arith.constant 0 : i32
    %47 = arith.cmpi eq, %arg0, %c0_i32_30 : i32
    %48 = arith.extui %47 : i1 to i32
    %c0_i32_31 = arith.constant 0 : i32
    %49 = arith.cmpi ne, %48, %c0_i32_31 : i32
    scf.if %49 {
      %c0_32 = arith.constant 0 : index
      %c0_33 = arith.constant 0 : index
      %50 = vector.load %arg17[%c0_32, %c0_33] : memref<8x128xf32, #tpu.memory_space<vmem>>, vector<8x128xf32>
      %c0_34 = arith.constant 0 : index
      %c0_35 = arith.constant 0 : index
      %51 = vector.load %arg11[%c0_34, %c0_35] : memref<128x128xf32, #tpu.memory_space<vmem>>, vector<128x128xf32>
      %cst_36 = arith.constant dense<0.000000e+00> : vector<8x128xf32>
      %52 = tpu.matmul %50, %51, %cst_36 {dimension_numbers = #tpu.dot_dimension_numbers<[1], [0], [0], [1], [0, 0, 1, 1], [], []>} : vector<8x128xf32>, vector<128x128xf32>, vector<8x128xf32> -> vector<8x128xf32>
      %c0_37 = arith.constant 0 : index
      %c0_38 = arith.constant 0 : index
      %53 = vector.load %arg12[%c0_37, %c0_38] : memref<1x128xf32, #tpu.memory_space<vmem>>, vector<1x128xf32>
      %54 = vector.broadcast %53 : vector<1x128xf32> to vector<8x128xf32>
      %55 = arith.addf %52, %54 : vector<8x128xf32>
      %cst_39 = arith.constant 0.000000e+00 : f32
      %56 = vector.broadcast %cst_39 : f32 to vector<8x128xf32>
      %57 = arith.maximumf %55, %56 : vector<8x128xf32>
      %58 = math.absf %55 : vector<8x128xf32>
      %cst_40 = arith.constant 0.000000e+00 : f32
      %59 = vector.broadcast %cst_40 : f32 to vector<8x128xf32>
      %60 = arith.subf %59, %58 : vector<8x128xf32>
      %61 = math.exp %60 : vector<8x128xf32>
      %cst_41 = arith.constant 1.000000e+00 : f32
      %62 = vector.broadcast %cst_41 : f32 to vector<8x128xf32>
      %63 = arith.addf %62, %61 : vector<8x128xf32>
      %64 = math.log %63 : vector<8x128xf32>
      %65 = arith.addf %57, %64 : vector<8x128xf32>
      %cst_42 = arith.constant 0.693147182 : f32
      %66 = vector.broadcast %cst_42 : f32 to vector<8x128xf32>
      %67 = arith.subf %65, %66 : vector<8x128xf32>
      %c0_43 = arith.constant 0 : index
      %c0_44 = arith.constant 0 : index
      %68 = vector.load %arg13[%c0_43, %c0_44] : memref<128x128xf32, #tpu.memory_space<vmem>>, vector<128x128xf32>
      %cst_45 = arith.constant dense<0.000000e+00> : vector<8x128xf32>
      %69 = tpu.matmul %67, %68, %cst_45 {dimension_numbers = #tpu.dot_dimension_numbers<[1], [0], [0], [1], [0, 0, 1, 1], [], []>} : vector<8x128xf32>, vector<128x128xf32>, vector<8x128xf32> -> vector<8x128xf32>
      %c0_46 = arith.constant 0 : index
      %c0_47 = arith.constant 0 : index
      %70 = vector.load %arg14[%c0_46, %c0_47] : memref<1x128xf32, #tpu.memory_space<vmem>>, vector<1x128xf32>
      %71 = vector.broadcast %70 : vector<1x128xf32> to vector<8x128xf32>
      %72 = arith.addf %69, %71 : vector<8x128xf32>
      %c0_48 = arith.constant 0 : index
      %c0_49 = arith.constant 0 : index
      %73 = vector.load %arg15[%c0_48, %c0_49] : memref<8x128xf32, #tpu.memory_space<vmem>>, vector<8x128xf32>
      tpu.vector_store %arg15[%c0_48, %c0_49], %72 {strides = array<i32>} : memref<8x128xf32, #tpu.memory_space<vmem>>, vector<8x128xf32>,
    } else {
    }
    return
  }
  func.func @transform_0(%arg0: i32) -> (i32, i32) {
    %c0_i32 = arith.constant 0 : i32
    %c0_i32_0 = arith.constant 0 : i32
    %c0_i32_1 = arith.constant 0 : i32
    return %c0_i32, %c0_i32_0 : i32, i32
  }
  func.func @transform_1(%arg0: i32) -> (i32, i32) {
    %c0_i32 = arith.constant 0 : i32
    %c0_i32_0 = arith.constant 0 : i32
    return %arg0, %c0_i32 : i32, i32
  }
  func.func @transform_2(%arg0: i32) -> (i32, i32) {
    %c0_i32 = arith.constant 0 : i32
    %c0_i32_0 = arith.constant 0 : i32
    return %c0_i32, %arg0 : i32, i32
  }
  func.func @transform_3(%arg0: i32) -> (i32, i32) {
    %c0_i32 = arith.constant 0 : i32
    %c0_i32_0 = arith.constant 0 : i32
    return %c0_i32, %arg0 : i32, i32
  }
  func.func @transform_4(%arg0: i32) -> (i32, i32) {
    %c0_i32 = arith.constant 0 : i32
    %c0_i32_0 = arith.constant 0 : i32
    return %c0_i32, %arg0 : i32, i32
  }
  func.func @transform_5(%arg0: i32) -> (i32, i32) {
    %c0_i32 = arith.constant 0 : i32
    %c0_i32_0 = arith.constant 0 : i32
    %c0_i32_1 = arith.constant 0 : i32
    return %c0_i32, %c0_i32_0 : i32, i32
  }
  func.func @transform_6(%arg0: i32) -> (i32, i32) {
    %c0_i32 = arith.constant 0 : i32
    %c0_i32_0 = arith.constant 0 : i32
    %c0_i32_1 = arith.constant 0 : i32
    return %c0_i32, %c0_i32_0 : i32, i32
  }
  func.func @transform_7(%arg0: i32) -> (i32, i32) {
    %c0_i32 = arith.constant 0 : i32
    %c0_i32_0 = arith.constant 0 : i32
    %c0_i32_1 = arith.constant 0 : i32
    return %c0_i32, %c0_i32_0 : i32, i32
  }
  func.func @transform_8(%arg0: i32) -> (i32, i32) {
    %c0_i32 = arith.constant 0 : i32
    %c0_i32_0 = arith.constant 0 : i32
    %c0_i32_1 = arith.constant 0 : i32
    return %c0_i32, %c0_i32_0 : i32, i32
  }
  func.func @transform_9(%arg0: i32) -> (i32, i32) {
    %c0_i32 = arith.constant 0 : i32
    %c0_i32_0 = arith.constant 0 : i32
    %c0_i32_1 = arith.constant 0 : i32
    return %c0_i32, %c0_i32_0 : i32, i32
  }
  func.func @transform_10(%arg0: i32) -> (i32, i32) {
    %c0_i32 = arith.constant 0 : i32
    %c0_i32_0 = arith.constant 0 : i32
    %c0_i32_1 = arith.constant 0 : i32
    return %c0_i32, %c0_i32_0 : i32, i32
  }
  func.func @transform_11(%arg0: i32) -> (i32, i32) {
    %c0_i32 = arith.constant 0 : i32
    %c0_i32_0 = arith.constant 0 : i32
    %c0_i32_1 = arith.constant 0 : i32
    return %c0_i32, %c0_i32_0 : i32, i32
  }
  func.func @transform_12(%arg0: i32) -> (i32, i32) {
    %c0_i32 = arith.constant 0 : i32
    %c0_i32_0 = arith.constant 0 : i32
    %c0_i32_1 = arith.constant 0 : i32
    return %c0_i32, %c0_i32_0 : i32, i32
  }
  func.func @transform_13(%arg0: i32) -> (i32, i32) {
    %c0_i32 = arith.constant 0 : i32
    %c0_i32_0 = arith.constant 0 : i32
    %c0_i32_1 = arith.constant 0 : i32
    return %c0_i32, %c0_i32_0 : i32, i32
  }
  func.func @transform_14(%arg0: i32) -> (i32, i32) {
    %c0_i32 = arith.constant 0 : i32
    %c0_i32_0 = arith.constant 0 : i32
    %c0_i32_1 = arith.constant 0 : i32
    return %c0_i32, %c0_i32_0 : i32, i32
  }
}

</mosaic_0001>

<bundles_post_ra>
// kernel: tpu_custom_call.1
= control target key start
LH: loop header
LB: loop body
LE: loop exit
PB: predicated region body
PF: predicated region fallthrough
CT: control target
= control target key end

     0   :  { %19 = vsyncpa [#allocation5], 0  ;;  %s2391_s0 = inlined_call_operand.hbm [shape: f32[8,128], index: 0, kind: input, shape index: {}]   ;;  %s2392_s1 = inlined_call_operand.hbm [shape: f32[128,128], index: 1, kind: input, shape index: {}]   ;;  %s2393_s2 = inlined_call_operand.vmem [shape: f32[1,128], index: 2, kind: input, shape index: {}]   ;;  %s2394_s3 = inlined_call_operand.vmem [shape: s32[1,128], index: 3, kind: input, shape index: {}]   ;;  %s2395_s4 = inlined_call_operand.vmem [shape: s32[1,128], index: 4, kind: input, shape index: {}]   ;;  %s2396_s5 = inlined_call_operand.hbm [shape: f32[128,128], index: 5, kind: input, shape index: {}]   ;;  %s2397_s6 = inlined_call_operand.hbm [shape: f32[128,128], index: 6, kind: input, shape index: {}]   ;;  %s2398_s7 = inlined_call_operand.vmem [shape: f32[1,128], index: 7, kind: input, shape index: {}]   ;;  %s2399_s8 = inlined_call_operand.hbm [shape: f32[128,128], index: 8, kind: input, shape index: {}]   ;;  %s2400_s9 = inlined_call_operand.vmem [shape: f32[1,128], index: 9, kind: input, shape index: {}]   ;;  %s2401_s10 = inlined_call_operand.hbm [shape: f32[128,128], index: 10, kind: input, shape index: {}]   ;;  %s2402_s11 = inlined_call_operand.vmem [shape: f32[1,128], index: 11, kind: input, shape index: {}]   ;;  %s2403_s12 = inlined_call_operand.hbm [shape: f32[128,128], index: 12, kind: input, shape index: {}]   ;;  %s2404_s13 = inlined_call_operand.vmem [shape: f32[1,128], index: 13, kind: input, shape index: {}]   ;;  %s2405_s14 = inlined_call_operand.hbm [shape: f32[8,128], index: 14, kind: output, shape index: {}]  }
   0x1   :  { %20 = vsyncpa [#allocation8], 0 }
   0x2   :  { %21 = vsyncpa [#allocation11], 0 }
   0x3   :  { %22 = vsyncpa [#allocation14], 0 }
   0x4   :  { %23 = vsyncpa [#allocation6], 0  ;;  %s2024_s29 = smov [#allocation7]  }
   0x5   :  { %s39_s30 = sshll.u32 %s2024_s29, 4  ;;  %s40_s30 = int_to_ptr.vmem [resolvable:$true] %s39_s30 }
   0x6   :  { %s1862_s15 = scalar_lea.vmem %s40_s30, 2048  ;;  %p1867_p1 = scmp.lt.s32.totalorder %s40_s30, %s40_s30 }
   0x7   :  { %p1863_p0 = scmp.ne.s32.totalorder %s40_s30, %s1862_s15  ;;  %p1868_p2 = scmp.lt.s32.totalorder %s1862_s15, %s1862_s15 }
   0x9   :  { %p1869_p3 = por %p1868_p2, %p1867_p1 }
   0xb   :  { %p1870_p4 = pnand %p1869_p3, %p1863_p0 }
   0xd   :  { %1873 = shalt.err (!%p1870_p4)
}
   0xe   :  { %s2025_s16 = smov 128   ;;  %s2026_s17 = smov 8  }
   0xf   :  { %45 = dma.hbm_to_vmem [thread:$0]  %s2392_s1, 2048, %s40_s30, [#allocation8], %s2025_s16, %s2025_s16, %s2026_s17  }
  0x10   :  { %s2027_s20 = smov [#allocation10]   ;;  %s2028_s22 = smov [#allocation13]  }
  0x11   :  { %s69_s21 = sshll.u32 %s2027_s20, 4  ;;  %s97_s23 = sshll.u32 %s2028_s22, 4  ;;  %s70_s21 = int_to_ptr.vmem [resolvable:$true] %s69_s21  ;;  %s98_s23 = int_to_ptr.vmem [resolvable:$true] %s97_s23 }
  0x12   :  { %s1882_s24 = scalar_lea.vmem %s70_s21, 2048  ;;  %p1887_p6 = scmp.lt.s32.totalorder %s70_s21, %s70_s21 }
  0x13   :  { %p1883_p5 = scmp.ne.s32.totalorder %s70_s21, %s1882_s24  ;;  %p1888_p7 = scmp.lt.s32.totalorder %s1882_s24, %s1882_s24 }
  0x15   :  { %p1889_p8 = por %p1888_p7, %p1887_p6 }
  0x17   :  { %p1890_p9 = pnand %p1889_p8, %p1883_p5 }
  0x19   :  { %1893 = shalt.err (!%p1890_p9)
}
  0x1a   :  { %75 = dma.hbm_to_vmem [thread:$0]  %s2397_s6, 2048, %s70_s21, [#allocation11], %s2025_s16, %s2025_s16, %s2026_s17  }
  0x1b   :  { %s1902_s1 = scalar_lea.vmem %s98_s23, 2048  ;;  %p1907_p11 = scmp.lt.s32.totalorder %s98_s23, %s98_s23 }
  0x1c   :  { %p1903_p10 = scmp.ne.s32.totalorder %s98_s23, %s1902_s1  ;;  %p1908_p12 = scmp.lt.s32.totalorder %s1902_s1, %s1902_s1 }
  0x1e   :  { %p1909_p13 = por %p1908_p12, %p1907_p11 }
  0x20   :  { %p1910_p0 = pnand %p1909_p13, %p1903_p10 }
  0x22   :  { %1913 = shalt.err (!%p1910_p0)
}
  0x23   :  { %103 = dma.hbm_to_vmem [thread:$0]  %s2401_s10, 2048, %s98_s23, [#allocation14], %s2025_s16, %s2025_s16, %s2026_s17  }
  0x24   :  { %s2029_s29 = smov [#allocation4]   ;;  %s2030_s15 = smov [#allocation9]  }
  0x25   :  { %s30_s30 = sshll.u32 %s2029_s29, 4  ;;  %s57_s6 = sshll.u32 %s2030_s15, 4  ;;  %s31_s30 = int_to_ptr.vmem [resolvable:$true] %s30_s30  ;;  %s58_s6 = int_to_ptr.vmem [resolvable:$true] %s57_s6 }
  0x26   :  { %s1922_s18 = scalar_lea.vmem %s31_s30, 128  ;;  %p1927_p2 = scmp.lt.s32.totalorder %s31_s30, %s31_s30 }
  0x27   :  { %p1923_p1 = scmp.ne.s32.totalorder %s31_s30, %s1922_s18  ;;  %p1928_p3 = scmp.lt.s32.totalorder %s1922_s18, %s1922_s18 }
  0x29   :  { %p1929_p4 = por %p1928_p3, %p1927_p2 }
  0x2b   :  { %p1930_p5 = pnand %p1929_p4, %p1923_p1 }
  0x2d   :  { %1933 = shalt.err (!%p1930_p5)
}
  0x2e   :  { %33 = dma.hbm_to_vmem [thread:$0]  %s2391_s0, 128, %s31_s30, [#allocation5]  }
  0x2f   :  { %s1942_s21 = scalar_lea.vmem %s58_s6, 2048  ;;  %p1947_p7 = scmp.lt.s32.totalorder %s58_s6, %s58_s6 }
  0x30   :  { %p1943_p6 = scmp.ne.s32.totalorder %s58_s6, %s1942_s21  ;;  %p1948_p8 = scmp.lt.s32.totalorder %s1942_s21, %s1942_s21 }
  0x32   :  { %p1949_p9 = por %p1948_p8, %p1947_p7 }
  0x34   :  { %p1950_p10 = pnand %p1949_p9, %p1943_p6 }
  0x36   :  { %1953 = shalt.err (!%p1950_p10)
}
  0x37   :  { %63 = dma.hbm_to_vmem [thread:$0]  %s2396_s5, 2048, %s58_s6, [#allocation8], %s2025_s16, %s2025_s16, %s2026_s17  }
  0x38   :  { %s2031_s23 = smov [#allocation12]   ;;  %s2032_s25 = smov [#allocation15]  }
  0x39   :  { %s83_s24 = sshll.u32 %s2031_s23, 4  ;;  %s111_s0 = sshll.u32 %s2032_s25, 4  ;;  %s84_s24 = int_to_ptr.vmem [resolvable:$true] %s83_s24  ;;  %s112_s0 = int_to_ptr.vmem [resolvable:$true] %s111_s0 }
  0x3a   :  { %s1962_s26 = scalar_lea.vmem %s84_s24, 2048  ;;  %p1967_p12 = scmp.lt.s32.totalorder %s84_s24, %s84_s24 }
  0x3b   :  { %p1963_p11 = scmp.ne.s32.totalorder %s84_s24, %s1962_s26  ;;  %p1968_p13 = scmp.lt.s32.totalorder %s1962_s26, %s1962_s26 }
  0x3d   :  { %p1969_p0 = por %p1968_p13, %p1967_p12 }
  0x3f   :  { %p1970_p1 = pnand %p1969_p0, %p1963_p11 }
  0x41   :  { %1973 = shalt.err (!%p1970_p1)
}
  0x42   :  { %89 = dma.hbm_to_vmem [thread:$0]  %s2399_s8, 2048, %s84_s24, [#allocation11], %s2025_s16, %s2025_s16, %s2026_s17  }
  0x43   :  { %s1982_s5 = scalar_lea.vmem %s112_s0, 2048  ;;  %p1987_p3 = scmp.lt.s32.totalorder %s112_s0, %s112_s0 }
  0x44   :  { %p1983_p2 = scmp.ne.s32.totalorder %s112_s0, %s1982_s5  ;;  %p1988_p4 = scmp.lt.s32.totalorder %s1982_s5, %s1982_s5 }
  0x46   :  { %p1989_p5 = por %p1988_p4, %p1987_p3 }
  0x48   :  { %p1990_p6 = pnand %p1989_p5, %p1983_p2 }
  0x4a   :  { %1993 = shalt.err (!%p1990_p6)
}
  0x4b   :  { %117 = dma.hbm_to_vmem [thread:$0]  %s2403_s12, 2048, %s112_s0, [#allocation14], %s2025_s16, %s2025_s16, %s2026_s17  }
  0x4c   :  { %2014 = dma.done.wait [#allocation5], 128  }
  0x4d   :  { %2015 = vsyncadd [#allocation5], 4294967168 }
  0x4e   :  { %2016 = dma.done.wait [#allocation8], 4096  }
  0x4f   :  { %2017 = vsyncadd [#allocation8], 4294963200 }
  0x50   :  { %2018 = dma.done.wait [#allocation11], 4096  }
  0x51   :  { %2019 = vsyncadd [#allocation11], 4294963200 }
  0x52   :  { %2020 = dma.done.wait [#allocation14], 4096  }
  0x53   :  { %2021 = vsyncadd [#allocation14], 4294963200  ;;  %v2033_v0 = vmov 0.0   ;;  %vm2034_vm0 = vmmov 0   ;;  %v265_v1 = vld [vmem:[#allocation10 + $0x78] sm:$0xff]  ;;  %v264_v2 = vld [vmem:[#allocation10 + $0x70] sm:$0xff]  ;;  %v746_v25 = vlaneseq }
  0x54   :  { %1496 = vmatprep.subr.mxu0 %v2033_v0  ;;  %1528 = vmatprep.mubr.msk.f32.mxu0 %vm2034_vm0, %v2033_v0  ;;  %v263_v3 = vld [vmem:[#allocation10 + $0x68] sm:$0xff]  ;;  %v161_v4 = vld [vmem:[#allocation9 + $0x78] sm:$0xff]  ;;  %v160_v5 = vld [vmem:[#allocation9 + $0x70] sm:$0xff]  ;;  %vm789_vm2 = vcmask 64512  }
  0x55   :  { %1531 = vmatprep.subr.mxu1 %v265_v1  ;;  %1497 = vmatpush3.msra.mxu0 %v161_v4  ;;  %v262_v6 = vld [vmem:[#allocation10 + $0x60] sm:$0xff]  ;;  %v159_v7 = vld [vmem:[#allocation9 + $0x68] sm:$0xff]  ;;  %v261_v8 = vld [vmem:[#allocation10 + $0x58] sm:$0xff]  ;;  %v2164_v30 = vshrl.u32 %v746_v25, 7 }
  0x56   :  { %1532 = vmatpush3.msra.mxu1 %v265_v1  ;;  %1498 = vmatprep.subr.mxu0 %v2033_v0  ;;  %v158_v9 = vld [vmem:[#allocation9 + $0x60] sm:$0xff]  ;;  %v260_v10 = vld [vmem:[#allocation10 + $0x50] sm:$0xff]  ;;  %v157_v11 = vld [vmem:[#allocation9 + $0x58] sm:$0xff] }
  0x57   :  { %1533 = vmatprep.subr.mxu1 %v264_v2  ;;  %1499 = vmatpush3.msra.mxu0 %v160_v5  ;;  %v259_v12 = vld [vmem:[#allocation10 + $0x48] sm:$0xff]  ;;  %v156_v13 = vld [vmem:[#allocation9 + $0x50] sm:$0xff]  ;;  %v258_v14 = vld [vmem:[#allocation10 + $0x40] sm:$0xff] }
  0x58   :  { %1534 = vmatpush3.msra.mxu1 %v264_v2  ;;  %1500 = vmatprep.subr.mxu0 %v2033_v0  ;;  %v155_v15 = vld [vmem:[#allocation9 + $0x48] sm:$0xff]  ;;  %v257_v16 = vld [vmem:[#allocation10 + $0x38] sm:$0xff]  ;;  %v154_v17 = vld [vmem:[#allocation9 + $0x40] sm:$0xff] }
  0x59   :  { %1535 = vmatprep.subr.mxu1 %v263_v3  ;;  %1501 = vmatpush3.msra.mxu0 %v159_v7  ;;  %v256_v18 = vld [vmem:[#allocation10 + $0x30] sm:$0xff]  ;;  %v234_v19 = vld [vmem:[#allocation7] sm:$0xff]  ;;  %v153_v20 = vld [vmem:[#allocation9 + $0x38] sm:$0xff] }
  0x5a   :  { %1536 = vmatpush3.msra.mxu1 %v263_v3  ;;  %1502 = vmatprep.subr.mxu0 %v2033_v0  ;;  %v255_v21 = vld [vmem:[#allocation10 + $0x28] sm:$0xff]  ;;  %v152_v22 = vld [vmem:[#allocation9 + $0x30] sm:$0xff]  ;;  %v254_v23 = vld [vmem:[#allocation10 + $0x20] sm:$0xff] }
  0x5b   :  { %1537 = vmatprep.subr.mxu1 %v262_v6  ;;  %1503 = vmatpush3.msra.mxu0 %v158_v9  ;;  %v151_v24 = vld [vmem:[#allocation9 + $0x28] sm:$0xff]  ;;  %v253_v26 = vld [vmem:[#allocation10 + $0x18] sm:$0xff]  ;;  %v150_v27 = vld [vmem:[#allocation9 + $0x20] sm:$0xff] }
  0x5c   :  { %1538 = vmatpush3.msra.mxu1 %v262_v6  ;;  %1504 = vmatprep.subr.mxu0 %v2033_v0  ;;  %v252_v28 = vld [vmem:[#allocation10 + $0x10] sm:$0xff]  ;;  %v149_v29 = vld [vmem:[#allocation9 + $0x18] sm:$0xff]  ;;  %v251_v31 = vld [vmem:[#allocation10 + $0x8] sm:$0xff] }
  0x5d   :  { %1539 = vmatprep.subr.mxu1 %v261_v8  ;;  %1505 = vmatpush3.msra.mxu0 %v157_v11  ;;  %v1323_v32 = vld [vmem:[%s2395_s4] ss:$0 sm:$0xff]  ;;  %v148_v33 = vld [vmem:[#allocation9 + $0x10] sm:$0xff]  ;;  %v250_v34 = vld [vmem:[#allocation10] sm:$0xff] }
  0x5e   :  { %1540 = vmatpush3.msra.mxu1 %v261_v8  ;;  %1506 = vmatprep.subr.mxu0 %v2033_v0  ;;  %v147_v35 = vld [vmem:[#allocation9 + $0x8] sm:$0xff]  ;;  %vm753_vm1 = vcmp.eq.s32.totalorder %v1323_v32, %v2164_v30  ;;  %v236_v37 = vld [vmem:[#allocation7 + $0x10] sm:$0xff]  ;;  %v146_v38 = vld [vmem:[#allocation9] sm:$0xff] }
  0x5f   :  { %1541 = vmatprep.subr.mxu1 %v260_v10  ;;  %1507 = vmatpush3.msra.mxu0 %v156_v13  ;;  %v235_v36 = vld [vmem:[#allocation7 + $0x8] sm:$0xff]  ;;  %v145_v39 = vld [vmem:[#allocation4] sm:$0xff]  ;;  %v1324_v40 = vsel %vm753_vm1, 1.0, %v2033_v0  ;;  %v238_v42 = vld [vmem:[#allocation7 + $0x20] sm:$0xff] }
  0x60   :  { %1542 = vmatpush3.msra.mxu1 %v260_v10  ;;  %1508 = vmatprep.subr.mxu0 %v2033_v0  ;;  %v237_v41 = vld [vmem:[#allocation7 + $0x18] sm:$0xff]  ;;  %v239_v43 = vld [vmem:[#allocation7 + $0x28] sm:$0xff]  ;;  %v240_v44 = vld [vmem:[#allocation7 + $0x30] sm:$0xff] }
  0x61   :  { %1543 = vmatprep.subr.mxu1 %v259_v12  ;;  %1509 = vmatpush3.msra.mxu0 %v155_v15  ;;  %v241_v45 = vld [vmem:[#allocation7 + $0x38] sm:$0xff]  ;;  %v242_v46 = vld [vmem:[#allocation7 + $0x40] sm:$0xff]  ;;  %v243_v47 = vld [vmem:[#allocation7 + $0x48] sm:$0xff] }
  0x62   :  { %1544 = vmatpush3.msra.mxu1 %v259_v12  ;;  %1510 = vmatprep.subr.mxu0 %v2033_v0  ;;  %v244_v48 = vld [vmem:[#allocation7 + $0x50] sm:$0xff]  ;;  %v245_v49 = vld [vmem:[#allocation7 + $0x58] sm:$0xff]  ;;  %v246_v50 = vld [vmem:[#allocation7 + $0x60] sm:$0xff] }
  0x63   :  { %1545 = vmatprep.subr.mxu1 %v258_v14  ;;  %1511 = vmatpush3.msra.mxu0 %v154_v17  ;;  %v247_v51 = vld [vmem:[#allocation7 + $0x68] sm:$0xff]  ;;  %v248_v52 = vld [vmem:[#allocation7 + $0x70] sm:$0xff]  ;;  %v249_v53 = vld [vmem:[#allocation7 + $0x78] sm:$0xff] }
  0x64   :  { %1546 = vmatpush3.msra.mxu1 %v258_v14  ;;  %1512 = vmatprep.subr.mxu0 %v2033_v0  ;;  %v593_v54 = vld [vmem:[#allocation12 + $0x78] sm:$0xff]  ;;  %v592_v55 = vld [vmem:[#allocation12 + $0x70] sm:$0xff]  ;;  %v591_v56 = vld [vmem:[#allocation12 + $0x68] sm:$0xff] }
  0x65   :  { %1547 = vmatprep.subr.mxu1 %v257_v16  ;;  %1563 = vmatprep.mubr.f32.mxu1 %v234_v19  ;;  %v590_v57 = vld [vmem:[#allocation12 + $0x60] sm:$0xff]  ;;  %v589_v58 = vld [vmem:[#allocation12 + $0x58] sm:$0xff]  ;;  %v588_v59 = vld [vmem:[#allocation12 + $0x50] sm:$0xff] }
  0x66   :  { %1548 = vmatpush3.msra.mxu1 %v257_v16  ;;  %1513 = vmatpush3.msra.mxu0 %v153_v20  ;;  %v587_v60 = vld [vmem:[#allocation12 + $0x48] sm:$0xff]  ;;  %v586_v61 = vld [vmem:[#allocation12 + $0x40] sm:$0xff]  ;;  %v585_v62 = vld [vmem:[#allocation12 + $0x38] sm:$0xff] }
  0x67   :  { %1549 = vmatprep.subr.mxu1 %v256_v18  ;;  %1514 = vmatprep.subr.mxu0 %v2033_v0  ;;  %v584_v63 = vld [vmem:[#allocation12 + $0x30] sm:$0xff]  ;;  %v583_v1 = vld [vmem:[#allocation12 + $0x28] sm:$0xff]  ;;  %v582_v2 = vld [vmem:[#allocation12 + $0x20] sm:$0xff] }
  0x68   :  { %1550 = vmatpush3.msra.mxu1 %v256_v18  ;;  %1515 = vmatpush3.msra.mxu0 %v152_v22  ;;  %v581_v3 = vld [vmem:[#allocation12 + $0x18] sm:$0xff]  ;;  %v580_v4 = vld [vmem:[#allocation12 + $0x10] sm:$0xff]  ;;  %v579_v5 = vld [vmem:[#allocation12 + $0x8] sm:$0xff] }
  0x69   :  { %1551 = vmatprep.subr.mxu1 %v255_v21  ;;  %1516 = vmatprep.subr.mxu0 %v2033_v0  ;;  %v578_v6 = vld [vmem:[#allocation12] sm:$0xff]  ;;  %v2184_v17 = vld [vmem:[%s2398_s7] ss:$0 sm:$0xff] }
  0x6a   :  { %1552 = vmatpush3.msra.mxu1 %v255_v21  ;;  %1517 = vmatpush3.msra.mxu0 %v151_v24 }
  0x6b   :  { %1553 = vmatprep.subr.mxu1 %v254_v23  ;;  %1518 = vmatprep.subr.mxu0 %v2033_v0 }
  0x6c   :  { %1554 = vmatpush3.msra.mxu1 %v254_v23  ;;  %1519 = vmatpush3.msra.mxu0 %v150_v27 }
  0x6d   :  { %1555 = vmatprep.subr.mxu1 %v253_v26  ;;  %1520 = vmatprep.subr.mxu0 %v2033_v0 }
  0x6e   :  { %1556 = vmatpush3.msra.mxu1 %v253_v26  ;;  %1521 = vmatpush3.msra.mxu0 %v149_v29 }
  0x6f   :  { %1557 = vmatprep.subr.mxu1 %v252_v28  ;;  %1522 = vmatprep.subr.mxu0 %v2033_v0 }
  0x70   :  { %1558 = vmatpush3.msra.mxu1 %v252_v28  ;;  %1523 = vmatpush3.msra.mxu0 %v148_v33 }
  0x71   :  { %1559 = vmatprep.subr.mxu1 %v251_v31  ;;  %1524 = vmatprep.subr.mxu0 %v2033_v0 }
  0x72   :  { %1560 = vmatpush3.msra.mxu1 %v251_v31  ;;  %1525 = vmatpush3.msra.mxu0 %v147_v35 }
  0x73   :  { %1561 = vmatprep.subr.mxu1 %v250_v34  ;;  %1526 = vmatprep.subr.mxu0 %v2033_v0 }
  0x74   :  { %1562 = vmatpush3.msra.mxu1 %v250_v34  ;;  %1527 = vmatpush3.msra.mxu0 %v146_v38 }
  0x75   :  { %1564 = vmatmul.mubr.f32.vlgmr.msra.gmra.mxu1 %v235_v36  ;;  %1529 = vmatmul.mubr.f32.vlgmr.msra.gmra.mxu0 %v145_v39 }
  0x76   :  { %1566 = vmatprep.mubr.f32.mxu1 %v236_v37  ;;  %757 = vxpose.xlu0.b32.start.end [1/1] (short) %v1324_v40, 128 }
  0x77   :  { %1587 = vmatprep.subr.mxu0 %v593_v54 }
  0x78   :  { %1588 = vmatpush3.msra.mxu0 %v593_v54 }
  0x79   :  { %1567 = vmatmul.mubr.f32.gmra.mxu1 %v237_v41  ;;  %1589 = vmatprep.subr.mxu0 %v592_v55 }
  0x7a   :  { %1569 = vmatprep.mubr.f32.mxu1 %v238_v42  ;;  %1590 = vmatpush3.msra.mxu0 %v592_v55 }
  0x7b   :  { %1591 = vmatprep.subr.mxu0 %v591_v56 }
  0x7c   :  { %1592 = vmatpush3.msra.mxu0 %v591_v56 }
  0x7d   :  { %1570 = vmatmul.mubr.f32.gmra.mxu1 %v239_v43  ;;  %1593 = vmatprep.subr.mxu0 %v590_v57 }
  0x7e   :  { %1572 = vmatprep.mubr.f32.mxu1 %v240_v44  ;;  %1594 = vmatpush3.msra.mxu0 %v590_v57 }
  0x7f   :  { %1595 = vmatprep.subr.mxu0 %v589_v58 }
  0x80   :  { %1596 = vmatpush3.msra.mxu0 %v589_v58 }
  0x81   :  { %1573 = vmatmul.mubr.f32.gmra.mxu1 %v241_v45  ;;  %1597 = vmatprep.subr.mxu0 %v588_v59 }
  0x82   :  { %1575 = vmatprep.mubr.f32.mxu1 %v242_v46  ;;  %1598 = vmatpush3.msra.mxu0 %v588_v59 }
  0x83   :  { %1599 = vmatprep.subr.mxu0 %v587_v60 }
  0x84   :  { %1600 = vmatpush3.msra.mxu0 %v587_v60 }
  0x85   :  { %1576 = vmatmul.mubr.f32.gmra.mxu1 %v243_v47  ;;  %1601 = vmatprep.subr.mxu0 %v586_v61 }
  0x86   :  { %1578 = vmatprep.mubr.f32.mxu1 %v244_v48  ;;  %1602 = vmatpush3.msra.mxu0 %v586_v61 }
  0x87   :  { %1603 = vmatprep.subr.mxu0 %v585_v62 }
  0x88   :  { %1604 = vmatpush3.msra.mxu0 %v585_v62 }
  0x89   :  { %1579 = vmatmul.mubr.f32.gmra.mxu1 %v245_v49  ;;  %1605 = vmatprep.subr.mxu0 %v584_v63 }
  0x8a   :  { %1581 = vmatprep.mubr.f32.mxu1 %v246_v50  ;;  %1606 = vmatpush3.msra.mxu0 %v584_v63 }
  0x8b   :  { %1607 = vmatprep.subr.mxu0 %v583_v1 }
  0x8c   :  { %1608 = vmatpush3.msra.mxu0 %v583_v1 }
  0x8d   :  { %1582 = vmatmul.mubr.f32.gmra.mxu1 %v247_v51  ;;  %1609 = vmatprep.subr.mxu0 %v582_v2 }
  0x8e   :  { %1584 = vmatprep.mubr.f32.mxu1 %v248_v52  ;;  %1610 = vmatpush3.msra.mxu0 %v582_v2 }
  0x8f   :  { %1611 = vmatprep.subr.mxu0 %v581_v3 }
  0x90   :  { %1612 = vmatpush3.msra.mxu0 %v581_v3 }
  0x91   :  { %1585 = vmatmul.mubr.f32.gmra.mxu1 %v249_v53  ;;  %1613 = vmatprep.subr.mxu0 %v580_v4 }
  0x92   :  { %1614 = vmatpush3.msra.mxu0 %v580_v4 }
  0x93   :  { %1615 = vmatprep.subr.mxu0 %v579_v5 }
  0x94   :  { %1616 = vmatpush3.msra.mxu0 %v579_v5 }
  0x95   :  { %1617 = vmatprep.subr.mxu0 %v578_v6 }
  0x96   :  { %1618 = vmatpush3.msra.mxu0 %v578_v6 }
  0x97   :  { %1669 = vmatprep.subr.mxu0 %v2033_v0 }
  0xf2   :  { %v773_v7 = vpop.trf.xlu0 }
  0xf3   :  { %1645 = vmatprep.mubr.msk.f32.mxu1 %vm789_vm2, %v773_v7 }
  0xf6   :  { %v774_v8 = vpop.trf.xlu0 }
  0xfa   :  { %v775_v9 = vpop.trf.xlu0 }
  0xfe   :  { %v776_v10 = vpop.trf.xlu0 }
 0x102   :  { %v777_v11 = vpop.trf.xlu0 }
 0x106   :  { %v778_v12 = vpop.trf.xlu0 }
 0x10a   :  { %v779_v13 = vpop.trf.xlu0 }
 0x10e   :  { %v780_v14 = vpop.trf.xlu0 }
 0x112   :  { %v2177_v15 = vpop.trf.xlu0 }
 0x116   :  { %v2179_v16 = vpop.trf.xlu0 }
 0x11a   :  { %v2186_v19 = vpop.trf.xlu0 }
 0x11e   :  { %v2202_v32 = vpop.trf.xlu0 }
 0x122   :  { %v785_v48 = vpop.trf.xlu0 }
 0x126   :  { %v786_v1 = vpop.trf.xlu0 }
 0x135   :  { %v1565_v18 = vpop.f32.mrf.mxu1  ;;  %v228_v22 = vpop.f32.mrf.mxu0 }
 0x136   :  { %v2189_v20 = vadd.f32 %v1565_v18, %v2184_v17  ;;  %1643 = vmatprep.subr.mxu1 %v228_v22 }
 0x137   :  { %v339_v21 = vpop.f32.mrf.mxu1  ;;  %v1530_v26 = vpop.f32.mrf.mxu0  ;;  %1644 = vmatpush3.msra.mxu1 %v228_v22 }
 0x138   :  { %v435_v23 = vand.u32 2147483647, %v2189_v20  ;;  %v2193_v24 = vadd.f32 %v2184_v17, %v339_v21  ;;  %1646 = vmatmul.mubr.msk.f32.vlgmr.msra.gmra.mxu1 %vm789_vm2, %v774_v8  ;;  %1704 = vmatprep.subr.mxu1 %v2033_v0 }
 0x139   :  { %v1568_v25 = vpop.f32.mrf.mxu1  ;;  %1648 = vmatprep.mubr.msk.f32.mxu1 %vm789_vm2, %v775_v9 }
 0x13a   :  { %v451_v27 = vsub.f32 0.0, %v435_v23  ;;  %v434_v28 = vand.u32 2147483647, %v2193_v24  ;;  %v2197_v29 = vadd.f32 %v1568_v25, %v2184_v17  ;;  %v787_v23 = vpop.trf.xlu0 }
 0x13b   :  { %v349_v31 = vpop.f32.mrf.mxu1 }
 0x13c   :  { %v468_v33 = vmul.f32 1.442695, %v451_v27  ;;  %v450_v34 = vsub.f32 0.0, %v434_v28  ;;  %v437_v35 = vand.u32 2147483647, %v2197_v29  ;;  %v2206_v36 = vadd.f32 %v2184_v17, %v349_v31  ;;  %1649 = vmatmul.mubr.msk.f32.gmra.mxu1 %vm789_vm2, %v776_v10 }
 0x13d   :  { %v1571_v37 = vpop.f32.mrf.mxu1  ;;  %1651 = vmatprep.mubr.msk.f32.mxu1 %vm789_vm2, %v777_v11 }
 0x13e   :  { %1786 = vpow2.f32 %v468_v33  ;;  %v466_v38 = vmul.f32 1.442695, %v450_v34  ;;  %v453_v39 = vsub.f32 0.0, %v437_v35  ;;  %v2209_v40 = vadd.f32 %v1571_v37, %v2184_v17 }
 0x13f   :  { %v436_v41 = vand.u32 2147483647, %v2206_v36  ;;  %v359_v42 = vpop.f32.mrf.mxu1 }
 0x140   :  { %1788 = vpow2.f32 %v466_v38  ;;  %v472_v43 = vmul.f32 1.442695, %v453_v39  ;;  %v439_v44 = vand.u32 2147483647, %v2209_v40  ;;  %v2216_v46 = vadd.f32 %v2184_v17, %v359_v42  ;;  %1652 = vmatmul.mubr.msk.f32.gmra.mxu1 %vm789_vm2, %v778_v12 }
 0x141   :  { %v452_v45 = vsub.f32 0.0, %v436_v41  ;;  %v1574_v47 = vpop.f32.mrf.mxu1  ;;  %1654 = vmatprep.mubr.msk.f32.mxu1 %vm789_vm2, %v779_v13 }
 0x142   :  { %1790 = vpow2.f32 %v472_v43  ;;  %v455_v49 = vsub.f32 0.0, %v439_v44  ;;  %v2219_v50 = vadd.f32 %v1574_v47, %v2184_v17  ;;  %v438_v52 = vand.u32 2147483647, %v2216_v46 }
 0x143   :  { %v470_v51 = vmul.f32 1.442695, %v452_v45  ;;  %v369_v53 = vpop.f32.mrf.mxu1 }
 0x144   :  { %v476_v54 = vmul.f32 1.442695, %v455_v49  ;;  %v441_v55 = vand.u32 2147483647, %v2219_v50  ;;  %v2226_v56 = vadd.f32 %v2184_v17, %v369_v53  ;;  %v454_v57 = vsub.f32 0.0, %v438_v52  ;;  %1655 = vmatmul.mubr.msk.f32.gmra.mxu1 %vm789_vm2, %v780_v14  ;;  %v788_v49 = vpop.trf.xlu0 }
 0x145   :  { %1792 = vpow2.f32 %v470_v51  ;;  %v1577_v58 = vpop.f32.mrf.mxu1  ;;  %1657 = vmatprep.mubr.msk.f32.mxu1 %vm789_vm2, %v2177_v15 }
 0x146   :  { %1794 = vpow2.f32 %v476_v54  ;;  %v457_v59 = vsub.f32 0.0, %v441_v55  ;;  %v440_v60 = vand.u32 2147483647, %v2226_v56  ;;  %v474_v61 = vmul.f32 1.442695, %v454_v57 }
 0x147   :  { %v2231_v62 = vadd.f32 %v1577_v58, %v2184_v17  ;;  %v379_v63 = vpop.f32.mrf.mxu1 }
 0x148   :  { %v480_v2 = vmul.f32 1.442695, %v457_v59  ;;  %v456_v3 = vsub.f32 0.0, %v440_v60  ;;  %v2236_v4 = vadd.f32 %v2184_v17, %v379_v63  ;;  %1796 = vpow2.f32 %v474_v61  ;;  %1658 = vmatmul.mubr.msk.f32.gmra.mxu1 %vm789_vm2, %v2179_v16 }
 0x149   :  { %v443_v5 = vand.u32 2147483647, %v2231_v62  ;;  %v1580_v6 = vpop.f32.mrf.mxu1  ;;  %1660 = vmatprep.mubr.msk.f32.mxu1 %vm789_vm2, %v2186_v19 }
 0x14a   :  { %1798 = vpow2.f32 %v480_v2  ;;  %v478_v7 = vmul.f32 1.442695, %v456_v3  ;;  %v442_v8 = vand.u32 2147483647, %v2236_v4  ;;  %v2243_v11 = vadd.f32 %v1580_v6, %v2184_v17 }
 0x14b   :  { %v1787_v9 = vpop.eup %1786  ;;  %v459_v10 = vsub.f32 0.0, %v443_v5  ;;  %v389_v12 = vpop.f32.mrf.mxu1 }
 0x14c   :  { %v499_v13 = vadd.f32 1.0, %v1787_v9  ;;  %1800 = vpow2.f32 %v478_v7  ;;  %v458_v14 = vsub.f32 0.0, %v442_v8  ;;  %v2248_v15 = vadd.f32 %v2184_v17, %v389_v12  ;;  %1661 = vmatmul.mubr.msk.f32.gmra.mxu1 %vm789_vm2, %v2202_v32 }
 0x14d   :  { %v1789_v18 = vpop.eup %1788  ;;  %v484_v21 = vmul.f32 1.442695, %v459_v10  ;;  %v445_v22 = vand.u32 2147483647, %v2243_v11  ;;  %v1583_v16 = vpop.f32.mrf.mxu1  ;;  %1663 = vmatprep.mubr.msk.f32.mxu1 %vm789_vm2, %v785_v48 }
 0x14e   :  { %1802 = vlog2.f32 %v499_v13  ;;  %v498_v25 = vadd.f32 1.0, %v1789_v18  ;;  %v482_v26 = vmul.f32 1.442695, %v458_v14  ;;  %v444_v28 = vand.u32 2147483647, %v2248_v15 }
 0x14f   :  { %v1791_v27 = vpop.eup %1790  ;;  %1804 = vpow2.f32 %v484_v21  ;;  %v461_v19 = vsub.f32 0.0, %v445_v22  ;;  %v2255_v31 = vadd.f32 %v1583_v16, %v2184_v17  ;;  %v399_v33 = vpop.f32.mrf.mxu1  ;;  %v419_v13 = vmax.f32 %v2189_v20, 0.0 }
 0x150   :  { %1806 = vlog2.f32 %v498_v25  ;;  %v501_v34 = vadd.f32 1.0, %v1791_v27  ;;  %v2259_v35 = vadd.f32 %v2184_v17, %v399_v33  ;;  %v460_v38 = vsub.f32 0.0, %v444_v28  ;;  %1664 = vmatmul.mubr.msk.f32.gmra.mxu1 %vm789_vm2, %v786_v1 }
 0x151   :  { %1808 = vpow2.f32 %v482_v26  ;;  %v488_v37 = vmul.f32 1.442695, %v461_v19  ;;  %v1586_v32 = vpop.f32.mrf.mxu1  ;;  %v447_v41 = vand.u32 2147483647, %v2255_v31  ;;  %1666 = vmatprep.mubr.msk.f32.mxu1 %vm789_vm2, %v787_v23  ;;  %v418_v21 = vmax.f32 %v2193_v24, 0.0 }
 0x152   :  { %v1793_v39 = vpop.eup %1792  ;;  %1810 = vlog2.f32 %v501_v34  ;;  %v446_v42 = vand.u32 2147483647, %v2259_v35  ;;  %v486_v45 = vmul.f32 1.442695, %v460_v38  ;;  %v2265_v47 = vadd.f32 %v1586_v32, %v2184_v17 }
 0x153   :  { %v1795_v43 = vpop.eup %1794  ;;  %v500_v44 = vadd.f32 1.0, %v1793_v39  ;;  %1812 = vpow2.f32 %v488_v37  ;;  %v409_v48 = vpop.f32.mrf.mxu1  ;;  %v463_v52 = vsub.f32 0.0, %v447_v41  ;;  %v421_v34 = vmax.f32 %v2197_v29, 0.0 }
 0x154   :  { %v503_v51 = vadd.f32 1.0, %v1795_v43  ;;  %v462_v53 = vsub.f32 0.0, %v446_v42  ;;  %v2269_v54 = vadd.f32 %v2184_v17, %v409_v48  ;;  %v449_v55 = vand.u32 2147483647, %v2265_v47  ;;  %1667 = vmatmul.mubr.msk.f32.gmra.mxu1 %vm789_vm2, %v788_v49 }
 0x155   :  { %1814 = vlog2.f32 %v500_v44  ;;  %v1797_v57 = vpop.eup %1796  ;;  %v492_v58 = vmul.f32 1.442695, %v463_v52  ;;  %1736 = vmatprep.mubr.msk.f32.mxu1 %vm2034_vm0, %v2033_v0  ;;  %v420_v32 = vmax.f32 %v2206_v36, 0.0  ;;  %v423_v49 = vmax.f32 %v2209_v40, 0.0 }
 0x156   :  { %1816 = vlog2.f32 %v503_v51  ;;  %v490_v59 = vmul.f32 1.442695, %v462_v53  ;;  %v502_v61 = vadd.f32 1.0, %v1797_v57  ;;  %v465_v63 = vsub.f32 0.0, %v449_v55 }
 0x157   :  { %v1799_v60 = vpop.eup %1798  ;;  %1818 = vpow2.f32 %v486_v45  ;;  %v448_v1 = vand.u32 2147483647, %v2269_v54  ;;  %v422_v52 = vmax.f32 %v2216_v46, 0.0  ;;  %v424_v40 = vmax.f32 %v2226_v56, 0.0 }
 0x158   :  { %v505_v17 = vadd.f32 1.0, %v1799_v60  ;;  %1820 = vpow2.f32 %v492_v58  ;;  %v496_v3 = vmul.f32 1.442695, %v465_v63  ;;  %v426_v56 = vmax.f32 %v2236_v4, 0.0 }
 0x159   :  { %v1801_v2 = vpop.eup %1800  ;;  %1822 = vlog2.f32 %v502_v61  ;;  %v464_v5 = vsub.f32 0.0, %v448_v1 }
 0x15a   :  { %1824 = vlog2.f32 %v505_v17  ;;  %v504_v6 = vadd.f32 1.0, %v1801_v2  ;;  %v425_v17 = vmax.f32 %v2219_v50, 0.0 }
 0x15b   :  { %v1803_v7 = vpop.eup %1802  ;;  %1826 = vpow2.f32 %v490_v59  ;;  %v494_v8 = vmul.f32 1.442695, %v464_v5 }
 0x15c   :  { %v1805_v9 = vpop.eup %1804  ;;  %v517_v10 = vmul.f32 0.6931472, %v1803_v7  ;;  %1828 = vlog2.f32 %v504_v6 }
 0x15d   :  { %v1807_v12 = vpop.eup %1806  ;;  %v507_v14 = vadd.f32 1.0, %v1805_v9  ;;  %1830 = vpow2.f32 %v496_v3 }
 0x15e   :  { %v1809_v18 = vpop.eup %1808  ;;  %1832 = vpow2.f32 %v494_v8  ;;  %v515_v22 = vmul.f32 0.6931472, %v1807_v12  ;;  %v547_v23 = vadd.f32 %v517_v10, %v419_v13 }
 0x15f   :  { %v1811_v16 = vpop.eup %1810  ;;  %1834 = vlog2.f32 %v507_v14  ;;  %v506_v25 = vadd.f32 1.0, %v1809_v18  ;;  %v427_v14 = vmax.f32 %v2231_v62, 0.0  ;;  %v428_v62 = vmax.f32 %v2248_v15, 0.0 }
 0x160   :  { %v1813_v26 = vpop.eup %1812  ;;  %v546_v27 = vadd.f32 %v515_v22, %v418_v21  ;;  %v521_v19 = vmul.f32 0.6931472, %v1811_v16  ;;  %v1307_v38 = vadd.f32 -0.6931472, %v547_v23 }
 0x161   :  { %1836 = vlog2.f32 %v506_v25  ;;  %v509_v28 = vadd.f32 1.0, %v1813_v26 }
 0x162   :  { %v1815_v33 = vpop.eup %1814  ;;  %v1306_v20 = vadd.f32 -0.6931472, %v546_v27  ;;  %v549_v41 = vadd.f32 %v521_v19, %v421_v34  ;;  %v429_v19 = vmax.f32 %v2243_v11, 0.0 }
 0x163   :  { %v1817_v37 = vpop.eup %1816  ;;  %1838 = vlog2.f32 %v509_v28  ;;  %v519_v24 = vmul.f32 0.6931472, %v1815_v33 }
 0x164   :  { %v1819_v39 = vpop.eup %1818  ;;  %1619 = vmatprep.mubr.f32.mxu0 %v1306_v20  ;;  %v525_v42 = vmul.f32 0.6931472, %v1817_v37  ;;  %v1309_v57 = vadd.f32 -0.6931472, %v549_v41 }
 0x165   :  { %v1821_v43 = vpop.eup %1820  ;;  %v508_v44 = vadd.f32 1.0, %v1819_v39  ;;  %1620 = vmatmul.mubr.f32.vlgmr.msra.gmra.mxu0 %v1307_v38  ;;  %v548_v45 = vadd.f32 %v519_v24, %v420_v32  ;;  %v431_v32 = vmax.f32 %v2255_v31, 0.0  ;;  %v430_v24 = vmax.f32 %v2259_v35, 0.0 }
 0x166   :  { %v1823_v48 = vpop.eup %1822  ;;  %v511_v51 = vadd.f32 1.0, %v1821_v43  ;;  %v551_v58 = vadd.f32 %v525_v42, %v423_v49  ;;  %v432_v49 = vmax.f32 %v2269_v54, 0.0  ;;  %v1102_v54 = vld [vmem:[#allocation13 + $0x60] sm:$0xff] }
 0x167   :  { %v1825_v29 = vpop.eup %1824  ;;  %1840 = vlog2.f32 %v508_v44  ;;  %v1308_v53 = vadd.f32 -0.6931472, %v548_v45  ;;  %v523_v36 = vmul.f32 0.6931472, %v1823_v48  ;;  %v433_v48 = vmax.f32 %v2265_v47, 0.0  ;;  %v1103_v47 = vld [vmem:[#allocation13 + $0x68] sm:$0xff] }
 0x168   :  { %v1827_v55 = vpop.eup %1826  ;;  %1842 = vlog2.f32 %v511_v51  ;;  %v529_v59 = vmul.f32 0.6931472, %v1825_v29  ;;  %v1311_v8 = vadd.f32 -0.6931472, %v551_v58  ;;  %v1101_v58 = vld [vmem:[#allocation13 + $0x58] sm:$0xff] }
 0x169   :  { %v1829_v60 = vpop.eup %1828  ;;  %v510_v61 = vadd.f32 1.0, %v1827_v55  ;;  %1622 = vmatprep.mubr.f32.mxu0 %v1308_v53  ;;  %v550_v63 = vadd.f32 %v523_v36, %v422_v52  ;;  %v1105_v55 = vld [vmem:[#allocation13 + $0x78] sm:$0xff] }
 0x16a   :  { %v1831_v1 = vpop.eup %1830  ;;  %1623 = vmatmul.mubr.f32.gmra.mxu0 %v1309_v57  ;;  %v527_v2 = vmul.f32 0.6931472, %v1829_v60  ;;  %v553_v10 = vadd.f32 %v529_v59, %v425_v17  ;;  %v1104_v57 = vld [vmem:[#allocation13 + $0x70] sm:$0xff]  ;;  %1705 = vmatpush3.msra.mxu1 %v1105_v55  ;;  %v1099_v60 = vld [vmem:[#allocation13 + $0x48] sm:$0xff] }
 0x16b   :  { %v1833_v46 = vpop.eup %1832  ;;  %1844 = vlog2.f32 %v510_v61  ;;  %v513_v3 = vadd.f32 1.0, %v1831_v1  ;;  %v1310_v5 = vadd.f32 -0.6931472, %v550_v63  ;;  %1706 = vmatprep.subr.mxu1 %v2033_v0  ;;  %v1100_v59 = vld [vmem:[#allocation13 + $0x50] sm:$0xff]  ;;  %v1098_v61 = vld [vmem:[#allocation13 + $0x40] sm:$0xff]  ;;  %v1097_v63 = vld [vmem:[#allocation13 + $0x38] sm:$0xff] }
 0x16c   :  { %v1835_v6 = vpop.eup %1834  ;;  %v512_v7 = vadd.f32 1.0, %v1833_v46  ;;  %v552_v9 = vadd.f32 %v527_v2, %v424_v40  ;;  %v1313_v22 = vadd.f32 -0.6931472, %v553_v10  ;;  %1707 = vmatpush3.msra.mxu1 %v1104_v57  ;;  %v1096_v1 = vld [vmem:[#allocation13 + $0x30] sm:$0xff]  ;;  %v1095_v17 = vld [vmem:[#allocation13 + $0x28] sm:$0xff]  ;;  %v1094_v40 = vld [vmem:[#allocation13 + $0x20] sm:$0xff] }
 0x16d   :  { %1846 = vlog2.f32 %v513_v3  ;;  %1625 = vmatprep.mubr.f32.mxu0 %v1310_v5  ;;  %v533_v12 = vmul.f32 0.6931472, %v1835_v6  ;;  %1708 = vmatprep.subr.mxu1 %v2033_v0  ;;  %v1093_v2 = vld [vmem:[#allocation13 + $0x18] sm:$0xff]  ;;  %v1092_v46 = vld [vmem:[#allocation13 + $0x10] sm:$0xff]  ;;  %v1091_v3 = vld [vmem:[#allocation13 + $0x8] sm:$0xff] }
 0x16e   :  { %v1837_v13 = vpop.eup %1836  ;;  %1848 = vlog2.f32 %v512_v7  ;;  %1626 = vmatmul.mubr.f32.gmra.mxu0 %v1311_v8  ;;  %v1312_v50 = vadd.f32 -0.6931472, %v552_v9  ;;  %1709 = vmatpush3.msra.mxu1 %v1103_v47 }
 0x16f   :  { %v531_v18 = vmul.f32 0.6931472, %v1837_v13  ;;  %v555_v16 = vadd.f32 %v533_v12, %v427_v14  ;;  %1710 = vmatprep.subr.mxu1 %v2033_v0 }
 0x170   :  { %v1839_v21 = vpop.eup %1838  ;;  %1628 = vmatprep.mubr.f32.mxu0 %v1312_v50  ;;  %1711 = vmatpush3.msra.mxu1 %v1102_v54 }
 0x171   :  { %v554_v23 = vadd.f32 %v531_v18, %v426_v56  ;;  %v537_v25 = vmul.f32 0.6931472, %v1839_v21  ;;  %v1315_v28 = vadd.f32 -0.6931472, %v555_v16  ;;  %1712 = vmatprep.subr.mxu1 %v2033_v0 }
 0x172   :  { %1629 = vmatmul.mubr.f32.gmra.mxu0 %v1313_v22  ;;  %1713 = vmatpush3.msra.mxu1 %v1101_v58 }
 0x173   :  { %v1314_v26 = vadd.f32 -0.6931472, %v554_v23  ;;  %v557_v4 = vadd.f32 %v537_v25, %v429_v19  ;;  %1714 = vmatprep.subr.mxu1 %v2033_v0 }
 0x174   :  { %v1841_v27 = vpop.eup %1840  ;;  %1715 = vmatpush3.msra.mxu1 %v1100_v59 }
 0x175   :  { %v1843_v33 = vpop.eup %1842  ;;  %1631 = vmatprep.mubr.f32.mxu0 %v1314_v26  ;;  %v535_v34 = vmul.f32 0.6931472, %v1841_v27  ;;  %v1317_v43 = vadd.f32 -0.6931472, %v557_v4  ;;  %1716 = vmatprep.subr.mxu1 %v2033_v0 }
 0x176   :  { %1632 = vmatmul.mubr.f32.gmra.mxu0 %v1315_v28  ;;  %v541_v20 = vmul.f32 0.6931472, %v1843_v33  ;;  %1717 = vmatpush3.msra.mxu1 %v1099_v60 }
 0x177   :  { %v556_v37 = vadd.f32 %v535_v34, %v428_v62  ;;  %1718 = vmatprep.subr.mxu1 %v2033_v0 }
 0x178   :  { %v1845_v38 = vpop.eup %1844  ;;  %v559_v11 = vadd.f32 %v541_v20, %v431_v32  ;;  %1719 = vmatpush3.msra.mxu1 %v1098_v61  ;;  %v1322_v32 = vld [vmem:[%s2400_s9] ss:$0 sm:$0xff] }
 0x179   :  { %v1316_v39 = vadd.f32 -0.6931472, %v556_v37  ;;  %v539_v41 = vmul.f32 0.6931472, %v1845_v38  ;;  %1720 = vmatprep.subr.mxu1 %v2033_v0 }
 0x17a   :  { %v1847_v42 = vpop.eup %1846  ;;  %v1319_v52 = vadd.f32 -0.6931472, %v559_v11  ;;  %1721 = vmatpush3.msra.mxu1 %v1097_v63 }
 0x17b   :  { %v1849_v44 = vpop.eup %1848  ;;  %1634 = vmatprep.mubr.f32.mxu0 %v1316_v39  ;;  %v558_v45 = vadd.f32 %v539_v41, %v430_v24  ;;  %v545_v15 = vmul.f32 0.6931472, %v1847_v42  ;;  %1722 = vmatprep.subr.mxu1 %v2033_v0 }
 0x17c   :  { %1635 = vmatmul.mubr.f32.gmra.mxu0 %v1317_v43  ;;  %v543_v51 = vmul.f32 0.6931472, %v1849_v44  ;;  %1723 = vmatpush3.msra.mxu1 %v1096_v1 }
 0x17d   :  { %v1318_v29 = vadd.f32 -0.6931472, %v558_v45  ;;  %v561_v53 = vadd.f32 %v545_v15, %v433_v48  ;;  %1724 = vmatprep.subr.mxu1 %v2033_v0 }
 0x17e   :  { %v560_v31 = vadd.f32 %v543_v51, %v432_v49  ;;  %1725 = vmatpush3.msra.mxu1 %v1095_v17 }
 0x17f   :  { %1637 = vmatprep.mubr.f32.mxu0 %v1318_v29  ;;  %v1321_v36 = vadd.f32 -0.6931472, %v561_v53  ;;  %1726 = vmatprep.subr.mxu1 %v2033_v0 }
 0x180   :  { %1638 = vmatmul.mubr.f32.gmra.mxu0 %v1319_v52  ;;  %v1320_v35 = vadd.f32 -0.6931472, %v560_v31  ;;  %1727 = vmatpush3.msra.mxu1 %v1094_v40 }
 0x181   :  { %1728 = vmatprep.subr.mxu1 %v2033_v0 }
 0x182   :  { %1640 = vmatprep.mubr.f32.mxu0 %v1320_v35  ;;  %1729 = vmatpush3.msra.mxu1 %v1093_v2 }
 0x183   :  { %1730 = vmatprep.subr.mxu1 %v2033_v0 }
 0x184   :  { %1641 = vmatmul.mubr.f32.gmra.mxu0 %v1321_v36  ;;  %1731 = vmatpush3.msra.mxu1 %v1092_v46 }
 0x185   :  { %1701 = vmatprep.mubr.msk.f32.mxu0 %vm2034_vm0, %v2033_v0  ;;  %1732 = vmatprep.subr.mxu1 %v2033_v0 }
 0x186   :  { %1733 = vmatpush3.msra.mxu1 %v1091_v3 }
 0x187   :  { %1734 = vmatprep.subr.mxu1 %v2033_v0 }
 0x1f8   :  { %v2309_v5 = vpop.f32.mrf.mxu1 }
 0x1fa   :  { %v2311_v6 = vpop.f32.mrf.mxu1 }
 0x1fc   :  { %v2313_v7 = vpop.f32.mrf.mxu1 }
 0x1fe   :  { %v2315_v8 = vpop.f32.mrf.mxu1 }
 0x200   :  { %v2319_v10 = vpop.f32.mrf.mxu1 }
 0x202   :  { %v2323_v13 = vpop.f32.mrf.mxu1 }
 0x204   :  { %v1656_v50 = vpop.f32.mrf.mxu1 }
 0x206   :  { %v934_v21 = vpop.f32.mrf.mxu1 }
 0x208   :  { %v1659_v16 = vpop.f32.mrf.mxu1 }
 0x20a   :  { %v944_v26 = vpop.f32.mrf.mxu1 }
 0x20c   :  { %v1662_v19 = vpop.f32.mrf.mxu1 }
 0x20e   :  { %v954_v33 = vpop.f32.mrf.mxu1 }
 0x210   :  { %v1665_v34 = vpop.f32.mrf.mxu1 }
 0x212   :  { %v964_v37 = vpop.f32.mrf.mxu1 }
 0x214   :  { %v1668_v39 = vpop.f32.mrf.mxu1 }
 0x216   :  { %v974_v45 = vpop.f32.mrf.mxu1 }
 0x225   :  { %v2317_v9 = vpop.f32.mrf.mxu0 }
 0x226   :  { %v673_v2 = vadd.f32 %v2317_v9, %v1322_v32 }
 0x227   :  { %v2321_v12 = vpop.f32.mrf.mxu0 }
 0x228   :  { %v668_v3 = vadd.f32 %v1322_v32, %v2321_v12  ;;  %v1207_v12 = vld [vmem:[#allocation15 + $0x70] sm:$0xff] }
 0x22a   :  { %v2325_v14 = vpop.f32.mrf.mxu0 }
 0x22b   :  { %v683_v63 = vadd.f32 %v2325_v14, %v1322_v32  ;;  %v1341_v14 = vld [vmem:[%s2394_s3] ss:$0 sm:$0xff] }
 0x22c   :  { %v2327_v56 = vpop.f32.mrf.mxu0  ;;  %vm1004_vm3 = vcmp.eq.s32.totalorder %v1341_v14, %v2164_v30 }
 0x22d   :  { %v678_v17 = vadd.f32 %v1322_v32, %v2327_v56  ;;  %v986_v46 = vmul.f32 %v2313_v7, %v683_v63  ;;  %v983_v7 = vmul.f32 %v2311_v6, %v668_v3  ;;  %v1208_v6 = vld [vmem:[#allocation15 + $0x78] sm:$0xff]  ;;  %v1205_v56 = vld [vmem:[#allocation15 + $0x60] sm:$0xff] }
 0x22e   :  { %v1627_v18 = vpop.f32.mrf.mxu0 }
 0x22f   :  { %v693_v58 = vadd.f32 %v1627_v18, %v1322_v32  ;;  %v1204_v18 = vld [vmem:[#allocation15 + $0x58] sm:$0xff] }
 0x230   :  { %v687_v22 = vpop.f32.mrf.mxu0 }
 0x231   :  { %v688_v60 = vadd.f32 %v1322_v32, %v687_v22  ;;  %v988_v1 = vmul.f32 %v2319_v10, %v693_v58  ;;  %v985_v10 = vmul.f32 %v2315_v8, %v678_v17  ;;  %v1342_v8 = vld [vmem:[%s2393_s2] ss:$0 sm:$0xff]  ;;  %v1202_v22 = vld [vmem:[#allocation15 + $0x48] sm:$0xff] }
 0x232   :  { %v1630_v23 = vpop.f32.mrf.mxu0 }
 0x233   :  { %v703_v55 = vadd.f32 %v1630_v23, %v1322_v32  ;;  %v987_v40 = vmul.f32 %v2323_v13, %v688_v60  ;;  %v984_v13 = vmul.f32 %v2309_v5, %v673_v2  ;;  %v1090_v5 = vld [vmem:[#allocation13] sm:$0xff]  ;;  %v1200_v23 = vld [vmem:[#allocation15 + $0x38] sm:$0xff] }
 0x234   :  { %v697_v25 = vpop.f32.mrf.mxu0  ;;  %1735 = vmatpush3.msra.mxu1 %v1090_v5 }
 0x235   :  { %v698_v47 = vadd.f32 %v1322_v32, %v697_v25  ;;  %v990_v59 = vmul.f32 %v1656_v50, %v703_v55  ;;  %v1206_v50 = vld [vmem:[#allocation15 + $0x68] sm:$0xff]  ;;  %v1199_v25 = vld [vmem:[#allocation15 + $0x30] sm:$0xff] }
 0x236   :  { %v1633_v27 = vpop.f32.mrf.mxu0 }
 0x237   :  { %v713_v31 = vadd.f32 %v1633_v27, %v1322_v32  ;;  %v989_v61 = vmul.f32 %v934_v21, %v698_v47  ;;  %v1203_v21 = vld [vmem:[#allocation15 + $0x50] sm:$0xff]  ;;  %v1197_v27 = vld [vmem:[#allocation15 + $0x20] sm:$0xff] }
 0x238   :  { %v707_v28 = vpop.f32.mrf.mxu0 }
 0x239   :  { %v708_v35 = vadd.f32 %v1322_v32, %v707_v28  ;;  %v992_v57 = vmul.f32 %v1659_v16, %v713_v31  ;;  %v1201_v16 = vld [vmem:[#allocation15 + $0x40] sm:$0xff]  ;;  %v1195_v28 = vld [vmem:[#allocation15 + $0x10] sm:$0xff] }
 0x23b   :  { %v991_v54 = vmul.f32 %v944_v26, %v708_v35  ;;  %v1198_v26 = vld [vmem:[#allocation15 + $0x28] sm:$0xff] }
 0x23c   :  { %v1636_v62 = vpop.f32.mrf.mxu0 }
 0x23d   :  { %v723_v49 = vadd.f32 %v1636_v62, %v1322_v32  ;;  %v1193_v62 = vld [vmem:[#allocation15] sm:$0xff] }
 0x23e   :  { %v717_v4 = vpop.f32.mrf.mxu0 }
 0x23f   :  { %v718_v29 = vadd.f32 %v1322_v32, %v717_v4  ;;  %v994_v53 = vmul.f32 %v1662_v19, %v723_v49  ;;  %v1196_v19 = vld [vmem:[#allocation15 + $0x18] sm:$0xff] }
 0x240   :  { %v1639_v20 = vpop.f32.mrf.mxu0 }
 0x241   :  { %v733_v43 = vadd.f32 %v1639_v20, %v1322_v32  ;;  %v993_v36 = vmul.f32 %v954_v33, %v718_v29  ;;  %v1194_v33 = vld [vmem:[#allocation15 + $0x8] sm:$0xff] }
 0x242   :  { %v727_v38 = vpop.f32.mrf.mxu0 }
 0x243   :  { %v728_v15 = vadd.f32 %v1322_v32, %v727_v38  ;;  %v996_v51 = vmul.f32 %v1665_v34, %v733_v43  ;;  %v1344_v34 = vld [vmem:[%s2402_s11] ss:$0 sm:$0xff]  ;;  %s2035_s11 = smov [#allocation16]  }
 0x244   :  { %v1642_v24 = vpop.f32.mrf.mxu0  ;;  %s1293_s20 = sshll.u32 %s2035_s11, 4  ;;  %s1294_s20 = int_to_ptr.vmem [resolvable:$true] %s1293_s20 }
 0x245   :  { %v743_v41 = vadd.f32 %v1642_v24, %v1322_v32  ;;  %v995_v52 = vmul.f32 %v964_v37, %v728_v15  ;;  %s1994_s21 = scalar_lea.vmem %s1294_s20, 128  ;;  %p1999_p8 = scmp.lt.s32.totalorder %s1294_s20, %s1294_s20 }
 0x246   :  { %v737_v42 = vpop.f32.mrf.mxu0  ;;  %p1995_p7 = scmp.ne.s32.totalorder %s1294_s20, %s1994_s21  ;;  %p2000_p9 = scmp.lt.s32.totalorder %s1994_s21, %s1994_s21 }
 0x247   :  { %v998_v11 = vmul.f32 %v1668_v39, %v743_v41  ;;  %v738_v44 = vadd.f32 %v1322_v32, %v737_v42 }
 0x248   :  { %p2001_p10 = por %p2000_p9, %p1999_p8 }
 0x249   :  { %v997_v48 = vmul.f32 %v974_v45, %v738_v44  ;;  %1670 = vmatpush3.msra.mxu0 %v998_v11  ;;  %v1346_v45 = vld [vmem:[%s2404_s13] ss:$0 sm:$0xff] }
 0x24a   :  { %1671 = vmatprep.subr.mxu0 %v2033_v0  ;;  %p2002_p11 = pnand %p2001_p10, %p1995_p7 }
 0x24b   :  { %1672 = vmatpush3.msra.mxu0 %v997_v48 }
 0x24c   :  { %1673 = vmatprep.subr.mxu0 %v2033_v0 }
 0x24d   :  { %1674 = vmatpush3.msra.mxu0 %v996_v51 }
 0x24e   :  { %1675 = vmatprep.subr.mxu0 %v2033_v0 }
 0x24f   :  { %1676 = vmatpush3.msra.mxu0 %v995_v52 }
 0x250   :  { %1677 = vmatprep.subr.mxu0 %v2033_v0 }
 0x251   :  { %1678 = vmatpush3.msra.mxu0 %v994_v53 }
 0x252   :  { %1679 = vmatprep.subr.mxu0 %v2033_v0 }
 0x253   :  { %1680 = vmatpush3.msra.mxu0 %v993_v36 }
 0x254   :  { %1681 = vmatprep.subr.mxu0 %v2033_v0 }
 0x255   :  { %1682 = vmatpush3.msra.mxu0 %v992_v57 }
 0x256   :  { %1683 = vmatprep.subr.mxu0 %v2033_v0 }
 0x257   :  { %1684 = vmatpush3.msra.mxu0 %v991_v54 }
 0x258   :  { %1685 = vmatprep.subr.mxu0 %v2033_v0 }
 0x259   :  { %1686 = vmatpush3.msra.mxu0 %v990_v59 }
 0x25a   :  { %1687 = vmatprep.subr.mxu0 %v2033_v0 }
 0x25b   :  { %1688 = vmatpush3.msra.mxu0 %v989_v61 }
 0x25c   :  { %1689 = vmatprep.subr.mxu0 %v2033_v0 }
 0x25d   :  { %1690 = vmatpush3.msra.mxu0 %v988_v1 }
 0x25e   :  { %1691 = vmatprep.subr.mxu0 %v2033_v0 }
 0x25f   :  { %1692 = vmatpush3.msra.mxu0 %v987_v40 }
 0x260   :  { %1693 = vmatprep.subr.mxu0 %v2033_v0 }
 0x261   :  { %1694 = vmatpush3.msra.mxu0 %v986_v46 }
 0x262   :  { %1695 = vmatprep.subr.mxu0 %v2033_v0 }
 0x263   :  { %1696 = vmatpush3.msra.mxu0 %v985_v10 }
 0x264   :  { %1697 = vmatprep.subr.mxu0 %v2033_v0 }
 0x265   :  { %1698 = vmatpush3.msra.mxu0 %v984_v13 }
 0x266   :  { %1699 = vmatprep.subr.mxu0 %v2033_v0 }
 0x267   :  { %1700 = vmatpush3.msra.mxu0 %v983_v7 }
 0x268   :  { %1702 = vmatmul.mubr.msk.f32.vlgmr.msra.gmra.mxu0 %vm1004_vm3, %v1342_v8  ;;  %1739 = vmatprep.subr.mxu0 %v2033_v0 }
 0x269   :  { %1771 = vmatprep.mubr.msk.f32.mxu0 %vm2034_vm0, %v2033_v0  ;;  %1740 = vmatpush3.msra.mxu0 %v1208_v6 }
 0x26a   :  { %1741 = vmatprep.subr.mxu0 %v2033_v0 }
 0x26b   :  { %1742 = vmatpush3.msra.mxu0 %v1207_v12 }
 0x26c   :  { %1743 = vmatprep.subr.mxu0 %v2033_v0 }
 0x26d   :  { %1744 = vmatpush3.msra.mxu0 %v1206_v50 }
 0x26e   :  { %1745 = vmatprep.subr.mxu0 %v2033_v0 }
 0x26f   :  { %1746 = vmatpush3.msra.mxu0 %v1205_v56 }
 0x270   :  { %1747 = vmatprep.subr.mxu0 %v2033_v0 }
 0x271   :  { %1748 = vmatpush3.msra.mxu0 %v1204_v18 }
 0x272   :  { %1749 = vmatprep.subr.mxu0 %v2033_v0 }
 0x273   :  { %1750 = vmatpush3.msra.mxu0 %v1203_v21 }
 0x274   :  { %1751 = vmatprep.subr.mxu0 %v2033_v0 }
 0x275   :  { %1752 = vmatpush3.msra.mxu0 %v1202_v22 }
 0x276   :  { %1753 = vmatprep.subr.mxu0 %v2033_v0 }
 0x277   :  { %1754 = vmatpush3.msra.mxu0 %v1201_v16 }
 0x278   :  { %1755 = vmatprep.subr.mxu0 %v2033_v0 }
 0x279   :  { %1756 = vmatpush3.msra.mxu0 %v1200_v23 }
 0x27a   :  { %1757 = vmatprep.subr.mxu0 %v2033_v0 }
 0x27b   :  { %1758 = vmatpush3.msra.mxu0 %v1199_v25 }
 0x27c   :  { %1759 = vmatprep.subr.mxu0 %v2033_v0 }
 0x27d   :  { %1760 = vmatpush3.msra.mxu0 %v1198_v26 }
 0x27e   :  { %1761 = vmatprep.subr.mxu0 %v2033_v0 }
 0x27f   :  { %1762 = vmatpush3.msra.mxu0 %v1197_v27 }
 0x280   :  { %1763 = vmatprep.subr.mxu0 %v2033_v0 }
 0x281   :  { %1764 = vmatpush3.msra.mxu0 %v1196_v19 }
 0x282   :  { %1765 = vmatprep.subr.mxu0 %v2033_v0 }
 0x283   :  { %1766 = vmatpush3.msra.mxu0 %v1195_v28 }
 0x284   :  { %1767 = vmatprep.subr.mxu0 %v2033_v0 }
 0x285   :  { %1768 = vmatpush3.msra.mxu0 %v1194_v33 }
 0x286   :  { %1769 = vmatprep.subr.mxu0 %v2033_v0 }
 0x287   :  { %1770 = vmatpush3.msra.mxu0 %v1193_v62 }
 0x328   :  { %v1080_v9 = vpop.f32.mrf.mxu0 }
 0x329   :  { %1737 = vmatmul.mubr.f32.vlgmr.msra.gmra.mxu1 %v1080_v9 }
 0x32a   :  { %v1703_v30 = vpop.f32.mrf.mxu0 }
 0x3e9   :  { %v1179_v4 = vpop.f32.mrf.mxu1 }
 0x3ea   :  { %v1180_v20 = vadd.f32 %v1344_v34, %v1179_v4 }
 0x3eb   :  { %v1738_v37 = vpop.f32.mrf.mxu1 }
 0x3ec   :  { %v1184_v38 = vand.u32 2147483647, %v1180_v20  ;;  %v1183_v43 = vmax.f32 %v1180_v20, 0.0 }
 0x3ee   :  { %v1185_v32 = vsub.f32 0.0, %v1184_v38 }
 0x3f0   :  { %v1186_v24 = vmul.f32 1.442695, %v1185_v32 }
 0x3f2   :  { %1850 = vpow2.f32 %v1186_v24 }
 0x3ff   :  { %v1851_v39 = vpop.eup %1850 }
 0x400   :  { %v1188_v41 = vadd.f32 1.0, %v1851_v39 }
 0x402   :  { %1852 = vlog2.f32 %v1188_v41 }
 0x40f   :  { %v1853_v42 = vpop.eup %1852 }
 0x410   :  { %v1190_v11 = vmul.f32 0.6931472, %v1853_v42 }
 0x412   :  { %v1191_v0 = vadd.f32 %v1190_v11, %v1183_v43 }
 0x414   :  { %v1345_v44 = vadd.f32 -0.6931472, %v1191_v0 }
 0x416   :  { %1772 = vmatmul.mubr.f32.vlgmr.msra.gmra.mxu0 %v1345_v44 }
 0x4d6   :  { %v1282_v15 = vpop.f32.mrf.mxu0 }
 0x4d7   :  { %v1283_v48 = vadd.f32 %v1346_v45, %v1282_v15 }
 0x4d8   :  { %v1773_v49 = vpop.f32.mrf.mxu0 }
 0x4d9   :  { %1286 = vst [vmem:[#allocation16] sm:$0xff] %v1283_v48 }
 0x4da   :  { %2005 = shalt.err (!%p2002_p11)
}
 0x4db   :  { %1296 = dma.vmem_to_hbm [thread:$0]  %s1294_s20, 128, %s2405_s14, [#allocation6]  }
 0x4dc   :  { %2022 = dma.done.wait [#allocation6], 128  }
 0x4dd   :  { %2023 = vsyncadd [#allocation6], 4294967168 }
 0x4de   :  { %1300 = vsyncpa [#allocation5], 1 }
 0x4df   :  { %1301 = vsyncpa [#allocation8], 1 }
 0x4e0   :  { %1302 = vsyncpa [#allocation11], 1 }
 0x4e1   :  { %1303 = vsyncpa [#allocation14], 1 }
 0x4e2   :  { %1304 = vsyncpa [#allocation6], 1 }

</bundles_post_ra>
